<compile_context>
chip_gen: v5e
topology: v5e:2x2
jax: 0.10.0
libtpu: 0.0.40
codegen_flags: <defaults>
</compile_context>

<pallas_src>
import numpy as np
import jax
import jax.numpy as jnp
from jax.experimental import pallas as pl
from jax.experimental.pallas import tpu as pltpu

GROUPSIZE = 128


def _round_up(a, b):
    return -(-a // b) * b


def _qlinear_w4_kernel(x_ref, wq_ref, s_ref, z_ref, b_ref, o_ref, wdq_ref):
    """One (tm, tn) output tile.

    x_ref:  (tm, K)   bf16 activations (natural column order)
    wq_ref: (tn, K/2) int8 repacked weight: byte j = (W[n, j] << 4) | W[n, j + K/2]
    s_ref:  (tn, G)   bf16 per-(row, group) scales
    z_ref:  (tn, G)   bf16 per-(row, group) zeros
    b_ref:  (1, tn)   f32 bias
    wdq_ref:(tn, K)   bf16 VMEM scratch: cached dequantized weight tile for this N block
    """
    k_full = wdq_ref.shape[1]
    kh = k_full // 2
    gh = s_ref.shape[1] // 2          # groups per half (repack needs K % 256 == 0)

    # Dequantize the weight tile once per N block; reuse it for every M block.
    @pl.when(pl.program_id(1) == 0)
    def _dequant_weights():
        s = s_ref[...]                # (tn, G) bf16
        z = z_ref[...]
        for g in range(gh):           # static, touches each element exactly once
            c0 = g * GROUPSIZE
            pg = wq_ref[:, c0:c0 + GROUPSIZE].astype(jnp.int32)     # (tn, 128)
            hi = ((pg >> 4) & 0xF).astype(jnp.bfloat16)             # columns c0 .. c0+127
            lo = (pg & 0xF).astype(jnp.bfloat16)                    # columns kh+c0 ..
            g_lo = gh + g
            wdq_ref[:, c0:c0 + GROUPSIZE] = (hi - z[:, g:g + 1]) * s[:, g:g + 1]
            wdq_ref[:, kh + c0:kh + c0 + GROUPSIZE] = (
                (lo - z[:, g_lo:g_lo + 1]) * s[:, g_lo:g_lo + 1])

    # bf16 x bf16 MXU matmul (x @ W_deq.T), f32 accumulation.
    acc = jax.lax.dot_general(
        x_ref[...], wdq_ref[...],
        dimension_numbers=(((1,), (1,)), ((), ())),
        preferred_element_type=jnp.float32)
    o_ref[...] = (acc + b_ref[...].astype(jnp.float32)).astype(o_ref.dtype)


def prepare_qlinear_weights(qweight_flat, scales, zeros, input_features, output_features):
    """One-time (offline) conversion of the module buffers into the kernel layout.

    Module format: qweight_flat (N*K/2,) int8 with byte j of row n = (W[n,2j]<<4)|W[n,2j+1];
                   scales/zeros (ceil(K/128)*N, 1) bf16, group-major per row.
    Kernel format: (N, K/2) int8 with byte j = (W[n,j]<<4)|W[n,j+K/2]; scales/zeros (N, G).
    """
    K, N = input_features, output_features
    assert K % (2 * GROUPSIZE) == 0, "kernel requires input_features % 256 == 0"
    Kh = K // 2
    G = K // GROUPSIZE

    p = qweight_flat.reshape(N, Kh).astype(jnp.int32)
    hi = (p >> 4) & 0xF                                   # original even columns
    lo = p & 0xF                                          # original odd columns
    w_int = jnp.stack([hi, lo], axis=-1).reshape(N, K)    # natural column order
    first, second = w_int[:, :Kh], w_int[:, Kh:]
    repacked_u8 = ((first << 4) | second).astype(jnp.uint8)
    repacked = jax.lax.bitcast_convert_type(repacked_u8, jnp.int8)

    s2 = scales.reshape(N, G).astype(jnp.bfloat16)
    z2 = zeros.reshape(N, G).astype(jnp.bfloat16)
    return repacked, s2, z2


def qlinear_a16w4_forward(x, wq_packed, scales2d, zeros2d, bias, output_features,
                          tm=256, tn=256):
    """Pallas forward for QLinearA16W4 (weights already converted by prepare_qlinear_weights)."""
    orig_shape = x.shape
    K = orig_shape[-1]
    N = output_features
    assert K % (2 * GROUPSIZE) == 0, "kernel requires input_features % 256 == 0"
    G = K // GROUPSIZE
    Kh = K // 2
    assert wq_packed.shape == (N, Kh)
    assert scales2d.shape == (N, G) and zeros2d.shape == (N, G)

    x2d = x.reshape(-1, K)
    M = x2d.shape[0]
    out_dtype = x.dtype

    # Tile selection: big M tiles (clamped to the actual M), 256-wide N tiles when possible.
    if N % tn != 0:
        tn = 128
    assert N % tn == 0, "output_features must be a multiple of 128"
    tm = min(tm, _round_up(M, 8))
    tm = _round_up(tm, 8)
    M_pad = _round_up(M, tm)

    xk = x2d.astype(jnp.bfloat16)
    if M_pad != M:
        xk = jnp.pad(xk, ((0, M_pad - M), (0, 0)))

    if bias is None:
        b2 = jnp.zeros((1, N), jnp.float32)
    else:
        b2 = bias.reshape(1, N).astype(jnp.float32)

    # Weight block constant over the inner (M) axis -> dequantize once, reuse for all M blocks.
    grid = (N // tn, M_pad // tm)

    out = pl.pallas_call(
        _qlinear_w4_kernel,
        out_shape=jax.ShapeDtypeStruct((M_pad, N), out_dtype),
        grid_spec=pltpu.PrefetchScalarGridSpec(
            num_scalar_prefetch=0,
            grid=grid,
            in_specs=[
                pl.BlockSpec((tm, K), lambda j, i: (i, 0)),     # activations (bf16)
                pl.BlockSpec((tn, Kh), lambda j, i: (j, 0)),    # repacked int4 weight (int8)
                pl.BlockSpec((tn, G), lambda j, i: (j, 0)),     # scales (bf16)
                pl.BlockSpec((tn, G), lambda j, i: (j, 0)),     # zeros (bf16)
                pl.BlockSpec((1, tn), lambda j, i: (0, j)),     # bias (f32)
            ],
            out_specs=pl.BlockSpec((tm, tn), lambda j, i: (i, j)),
            scratch_shapes=[pltpu.VMEM((tn, K), jnp.bfloat16)],
        ),
        compiler_params=pltpu.CompilerParams(
            dimension_semantics=("parallel", "arbitrary")),
    )(xk, wq_packed, scales2d, zeros2d, b2)

    if M_pad != M:
        out = out[:M]
    return out.reshape(orig_shape[:-1] + (N,))


def reference_forward(x, qweight_flat, scales, zeros, bias, output_features):
    """Pure-JAX reference mirroring python_decompress + DeQfunc_4bit_g + mm + bias."""
    K = x.shape[-1]
    N = output_features
    p = qweight_flat.reshape(-1, 1).astype(jnp.int32)
    hi = (p >> 4) & 0xF
    lo = p & 0xF
    fint = jnp.concatenate([hi, lo], axis=1).reshape(-1, GROUPSIZE)
    # torch does the dequant in bf16 (int8 - bf16 -> bf16), then casts to the input dtype
    w = ((fint.astype(jnp.bfloat16) - zeros) * scales).astype(jnp.float32).reshape(N, K)
    x2d = x.reshape(-1, K).astype(jnp.float32)
    out = jnp.dot(x2d, w.T, precision=jax.lax.Precision.HIGHEST)
    if bias is not None:
        out = out + bias.astype(jnp.float32)
    return out.reshape(x.shape[:-1] + (N,))


if __name__ == "__main__":
    key = jax.random.PRNGKey(0)
    k1, k2, k3, k4, k5 = jax.random.split(key, 5)

    in_features, out_features = 512, 384
    B, S = 2, 16
    G = in_features // GROUPSIZE

    # deterministic synthetic 4-bit weight, packed exactly like the torch module buffer
    w_int = np.asarray(jax.random.randint(k1, (out_features, in_features), 0, 16,
                                          dtype=jnp.int32))
    packed = ((w_int[:, 0::2] << 4) | w_int[:, 1::2]).astype(np.uint8).view(np.int8)
    qweight = jnp.asarray(packed.reshape(-1))                   # (N*K/2,) int8 flat buffer

    scales = jax.random.uniform(k2, (G * out_features, 1),
                                minval=0.01, maxval=0.05).astype(jnp.bfloat16)
    zeros = jnp.round(jax.random.uniform(k3, (G * out_features, 1),
                                         minval=0.0, maxval=15.0)).astype(jnp.bfloat16)
    bias = (0.1 * jax.random.normal(k4, (out_features,))).astype(jnp.float32)
    x = jax.random.normal(k5, (B, S, in_features), dtype=jnp.float32)

    # one-time weight layout conversion (offline in a real deployment)
    wq2, s2, z2 = prepare_qlinear_weights(qweight, scales, zeros, in_features, out_features)

    # default (performance) tiles
    out_default = jax.block_until_ready(
        qlinear_a16w4_forward(x, wq2, s2, z2, bias, out_features))
    # small explicit tiles: grid (3, 2) exercises the cached-dequant / multi-M-block path
    out_small = jax.block_until_ready(
        qlinear_a16w4_forward(x, wq2, s2, z2, bias, out_features, tm=16, tn=128))

    ref = reference_forward(x, qweight, scales, zeros, bias, out_features)
    assert out_default.shape == (B, S, out_features)
    for name, out in (("default_tiles", out_default), ("small_tiles", out_small)):
        o32 = out.astype(jnp.float32)
        max_err = float(jnp.max(jnp.abs(o32 - ref)))
        if not bool(jnp.allclose(o32, ref, rtol=2e-2, atol=5e-2)):
            raise AssertionError(f"{name}: kernel mismatch, max abs err = {max_err}")

    print("KERNEL_OK")
</pallas_src>

<mosaic_0001>
module attributes {stable_mosaic.version = 11 : i64} {
  func.func @_qlinear_w4_kernel(%arg0: i32, %arg1: i32, %arg2: memref<32x512xbf16, #tpu.memory_space<vmem>>, %arg3: memref<128x256xi8, #tpu.memory_space<vmem>>, %arg4: memref<128x4xbf16, #tpu.memory_space<vmem>>, %arg5: memref<128x4xbf16, #tpu.memory_space<vmem>>, %arg6: memref<1x128xf32, #tpu.memory_space<vmem>>, %arg7: memref<32x128xf32, #tpu.memory_space<vmem>>, %arg8: memref<128x512xbf16, #tpu.memory_space<vmem>>) attributes {dimension_semantics = [#tpu.dimension_semantics<parallel>, #tpu.dimension_semantics<arbitrary>], iteration_bounds = array<i64: 3, 1>, scalar_prefetch = 0 : i64, scratch_operands = 1 : i64, tpu.core_type = #tpu.core_type<tc>, window_params = [{transform_indices = @transform_0, window_bounds = array<i64: 32, 512>}, {transform_indices = @transform_1, window_bounds = array<i64: 128, 256>}, {transform_indices = @transform_2, window_bounds = array<i64: 128, 4>}, {transform_indices = @transform_3, window_bounds = array<i64: 128, 4>}, {transform_indices = @transform_4, window_bounds = array<i64: 1, 128>}, {transform_indices = @transform_5, window_bounds = array<i64: 32, 128>}]} {
    %c0_i32 = arith.constant 0 : i32
    %0 = arith.cmpi eq, %arg1, %c0_i32 : i32
    %1 = arith.extui %0 : i1 to i32
    %c0_i32_0 = arith.constant 0 : i32
    %2 = arith.cmpi ne, %1, %c0_i32_0 : i32
    scf.if %2 {
      %c0_8 = arith.constant 0 : index
      %c0_9 = arith.constant 0 : index
      %10 = vector.load %arg4[%c0_8, %c0_9] : memref<128x4xbf16, #tpu.memory_space<vmem>>, vector<128x4xbf16>
      %c0_10 = arith.constant 0 : index
      %c0_11 = arith.constant 0 : index
      %11 = vector.load %arg5[%c0_10, %c0_11] : memref<128x4xbf16, #tpu.memory_space<vmem>>, vector<128x4xbf16>
      %c0_12 = arith.constant 0 : index
      %c0_13 = arith.constant 0 : index
      %12 = vector.load %arg3[%c0_12, %c0_13] : memref<128x256xi8, #tpu.memory_space<vmem>>, vector<128x128xi8>
      %13 = arith.extsi %12 : vector<128x128xi8> to vector<128x128xi32>
      %c4_i32 = arith.constant 4 : i32
      %14 = vector.broadcast %c4_i32 : i32 to vector<128x128xi32>
      %15 = arith.shrsi %13, %14 : vector<128x128xi32>
      %c15_i32 = arith.constant 15 : i32
      %16 = vector.broadcast %c15_i32 : i32 to vector<128x128xi32>
      %17 = arith.andi %15, %16 : vector<128x128xi32>
      %18 = arith.sitofp %17 : vector<128x128xi32> to vector<128x128xbf16>
      %c15_i32_14 = arith.constant 15 : i32
      %19 = vector.broadcast %c15_i32_14 : i32 to vector<128x128xi32>
      %20 = arith.andi %13, %19 : vector<128x128xi32>
      %21 = arith.sitofp %20 : vector<128x128xi32> to vector<128x128xbf16>
      %22 = vector.extract_strided_slice %11 {offsets = [0, 0], sizes = [128, 1], strides = [1, 1]} : vector<128x4xbf16> to vector<128x1xbf16>
      %23 = vector.broadcast %22 : vector<128x1xbf16> to vector<128x128xbf16>
      %24 = arith.subf %18, %23 : vector<128x128xbf16>
      %25 = vector.extract_strided_slice %10 {offsets = [0, 0], sizes = [128, 1], strides = [1, 1]} : vector<128x4xbf16> to vector<128x1xbf16>
      %26 = vector.broadcast %25 : vector<128x1xbf16> to vector<128x128xbf16>
      %27 = arith.mulf %24, %26 : vector<128x128xbf16>
      %c0_15 = arith.constant 0 : index
      %c0_16 = arith.constant 0 : index
      %28 = vector.load %arg8[%c0_15, %c0_16] : memref<128x512xbf16, #tpu.memory_space<vmem>>, vector<128x128xbf16>
      tpu.vector_store %arg8[%c0_15, %c0_16], %27 {strides = array<i32>} : memref<128x512xbf16, #tpu.memory_space<vmem>>, vector<128x128xbf16>,
      %29 = vector.extract_strided_slice %11 {offsets = [0, 2], sizes = [128, 1], strides = [1, 1]} : vector<128x4xbf16> to vector<128x1xbf16>
      %30 = vector.broadcast %29 : vector<128x1xbf16> to vector<128x128xbf16>
      %31 = arith.subf %21, %30 : vector<128x128xbf16>
      %32 = vector.extract_strided_slice %10 {offsets = [0, 2], sizes = [128, 1], strides = [1, 1]} : vector<128x4xbf16> to vector<128x1xbf16>
      %33 = vector.broadcast %32 : vector<128x1xbf16> to vector<128x128xbf16>
      %34 = arith.mulf %31, %33 : vector<128x128xbf16>
      %c0_17 = arith.constant 0 : index
      %c256 = arith.constant 256 : index
      %35 = vector.load %arg8[%c0_17, %c256] : memref<128x512xbf16, #tpu.memory_space<vmem>>, vector<128x128xbf16>
      tpu.vector_store %arg8[%c0_17, %c256], %34 {strides = array<i32>} : memref<128x512xbf16, #tpu.memory_space<vmem>>, vector<128x128xbf16>,
      %c0_18 = arith.constant 0 : index
      %c128 = arith.constant 128 : index
      %36 = vector.load %arg3[%c0_18, %c128] : memref<128x256xi8, #tpu.memory_space<vmem>>, vector<128x128xi8>
      %37 = arith.extsi %36 : vector<128x128xi8> to vector<128x128xi32>
      %c4_i32_19 = arith.constant 4 : i32
      %38 = vector.broadcast %c4_i32_19 : i32 to vector<128x128xi32>
      %39 = arith.shrsi %37, %38 : vector<128x128xi32>
      %c15_i32_20 = arith.constant 15 : i32
      %40 = vector.broadcast %c15_i32_20 : i32 to vector<128x128xi32>
      %41 = arith.andi %39, %40 : vector<128x128xi32>
      %42 = arith.sitofp %41 : vector<128x128xi32> to vector<128x128xbf16>
      %c15_i32_21 = arith.constant 15 : i32
      %43 = vector.broadcast %c15_i32_21 : i32 to vector<128x128xi32>
      %44 = arith.andi %37, %43 : vector<128x128xi32>
      %45 = arith.sitofp %44 : vector<128x128xi32> to vector<128x128xbf16>
      %46 = vector.extract_strided_slice %11 {offsets = [0, 1], sizes = [128, 1], strides = [1, 1]} : vector<128x4xbf16> to vector<128x1xbf16>
      %47 = vector.broadcast %46 : vector<128x1xbf16> to vector<128x128xbf16>
      %48 = arith.subf %42, %47 : vector<128x128xbf16>
      %49 = vector.extract_strided_slice %10 {offsets = [0, 1], sizes = [128, 1], strides = [1, 1]} : vector<128x4xbf16> to vector<128x1xbf16>
      %50 = vector.broadcast %49 : vector<128x1xbf16> to vector<128x128xbf16>
      %51 = arith.mulf %48, %50 : vector<128x128xbf16>
      %c0_22 = arith.constant 0 : index
      %c128_23 = arith.constant 128 : index
      %52 = vector.load %arg8[%c0_22, %c128_23] : memref<128x512xbf16, #tpu.memory_space<vmem>>, vector<128x128xbf16>
      tpu.vector_store %arg8[%c0_22, %c128_23], %51 {strides = array<i32>} : memref<128x512xbf16, #tpu.memory_space<vmem>>, vector<128x128xbf16>,
      %53 = vector.extract_strided_slice %11 {offsets = [0, 3], sizes = [128, 1], strides = [1, 1]} : vector<128x4xbf16> to vector<128x1xbf16>
      %54 = vector.broadcast %53 : vector<128x1xbf16> to vector<128x128xbf16>
      %55 = arith.subf %45, %54 : vector<128x128xbf16>
      %56 = vector.extract_strided_slice %10 {offsets = [0, 3], sizes = [128, 1], strides = [1, 1]} : vector<128x4xbf16> to vector<128x1xbf16>
      %57 = vector.broadcast %56 : vector<128x1xbf16> to vector<128x128xbf16>
      %58 = arith.mulf %55, %57 : vector<128x128xbf16>
      %c0_24 = arith.constant 0 : index
      %c384 = arith.constant 384 : index
      %59 = vector.load %arg8[%c0_24, %c384] : memref<128x512xbf16, #tpu.memory_space<vmem>>, vector<128x128xbf16>
      tpu.vector_store %arg8[%c0_24, %c384], %58 {strides = array<i32>} : memref<128x512xbf16, #tpu.memory_space<vmem>>, vector<128x128xbf16>,
    } else {
    }
    %c0 = arith.constant 0 : index
    %c0_1 = arith.constant 0 : index
    %3 = vector.load %arg2[%c0, %c0_1] : memref<32x512xbf16, #tpu.memory_space<vmem>>, vector<32x512xbf16>
    %c0_2 = arith.constant 0 : index
    %c0_3 = arith.constant 0 : index
    %4 = vector.load %arg8[%c0_2, %c0_3] : memref<128x512xbf16, #tpu.memory_space<vmem>>, vector<128x512xbf16>
    %cst = arith.constant dense<0.000000e+00> : vector<32x128xf32>
    %5 = tpu.matmul %3, %4, %cst {dimension_numbers = #tpu.dot_dimension_numbers<[1], [1], [0], [0], [0, 0, 1, 0], [], []>} : vector<32x512xbf16>, vector<128x512xbf16>, vector<32x128xf32> -> vector<32x128xf32>
    %c0_4 = arith.constant 0 : index
    %c0_5 = arith.constant 0 : index
    %6 = vector.load %arg6[%c0_4, %c0_5] : memref<1x128xf32, #tpu.memory_space<vmem>>, vector<1x128xf32>
    %7 = vector.broadcast %6 : vector<1x128xf32> to vector<32x128xf32>
    %8 = arith.addf %5, %7 : vector<32x128xf32>
    %c0_6 = arith.constant 0 : index
    %c0_7 = arith.constant 0 : index
    %9 = vector.load %arg7[%c0_6, %c0_7] : memref<32x128xf32, #tpu.memory_space<vmem>>, vector<32x128xf32>
    tpu.vector_store %arg7[%c0_6, %c0_7], %8 {strides = array<i32>} : memref<32x128xf32, #tpu.memory_space<vmem>>, vector<32x128xf32>,
    return
  }
  func.func @transform_0(%arg0: i32, %arg1: i32) -> (i32, i32) {
    %c0_i32 = arith.constant 0 : i32
    %c0_i32_0 = arith.constant 0 : i32
    return %arg1, %c0_i32 : i32, i32
  }
  func.func @transform_1(%arg0: i32, %arg1: i32) -> (i32, i32) {
    %c0_i32 = arith.constant 0 : i32
    %c0_i32_0 = arith.constant 0 : i32
    return %arg0, %c0_i32 : i32, i32
  }
  func.func @transform_2(%arg0: i32, %arg1: i32) -> (i32, i32) {
    %c0_i32 = arith.constant 0 : i32
    %c0_i32_0 = arith.constant 0 : i32
    return %arg0, %c0_i32 : i32, i32
  }
  func.func @transform_3(%arg0: i32, %arg1: i32) -> (i32, i32) {
    %c0_i32 = arith.constant 0 : i32
    %c0_i32_0 = arith.constant 0 : i32
    return %arg0, %c0_i32 : i32, i32
  }
  func.func @transform_4(%arg0: i32, %arg1: i32) -> (i32, i32) {
    %c0_i32 = arith.constant 0 : i32
    %c0_i32_0 = arith.constant 0 : i32
    return %c0_i32, %arg0 : i32, i32
  }
  func.func @transform_5(%arg0: i32, %arg1: i32) -> (i32, i32) {
    %c0_i32 = arith.constant 0 : i32
    return %arg1, %arg0 : i32, i32
  }
}

</mosaic_0001>

<bundles_post_ra>
// kernel: tpu_custom_call.1
= control target key start
LH: loop header
LB: loop body
LE: loop exit
PB: predicated region body
PF: predicated region fallthrough
CT: control target
= control target key end

     0   :  { %10 = vsyncpa [#allocation4], 0  ;;  %s4110_s0 = inlined_call_operand.vmem [shape: bf16[32,512], index: 0, kind: input, shape index: {}]   ;;  %s4111_s1 = inlined_call_operand.vmem [shape: s8[384,256], index: 1, kind: input, shape index: {}]   ;;  %s4112_s2 = inlined_call_operand.vmem [shape: bf16[384,4], index: 2, kind: input, shape index: {}]   ;;  %s4113_s3 = inlined_call_operand.vmem [shape: bf16[384,4], index: 3, kind: input, shape index: {}]   ;;  %s4114_s4 = inlined_call_operand.vmem [shape: f32[1,384], index: 4, kind: input, shape index: {}]   ;;  %s4115_s5 = inlined_call_operand.hbm [shape: f32[32,384], index: 5, kind: output, shape index: {}]  }
   0x1   :  { %12 = vsyncpa [#allocation4 + $0x1], 0  ;;  %s3189_s18 = smov 0   ;;  %s3191_s19 = smov 0  }
   0x2   :  { %s3193_s20 = smov 0   ;;  %s3195_s21 = smov 0  }
   0x3   :  { %s3197_s22 = smov 0   ;;  %s3199_s23 = smov 0  }
   0x4 LB: > { %s2720_s24 = sadd.s32 4294967295, %s3149_s23   ;;  %s2721_s25 = sadd.s32 4294967294, %s3149_s23   ;;  %s3149_s23 = sphi %s3199_s23, %s18_s23   ;;  %s3145_s22 = sphi %s3197_s22, %s4158_s22   ;;  %s3141_s21 = sphi %s3195_s21, %s4157_s21   ;;  %s3137_s20 = sphi %s3193_s20, %s4156_s20   ;;  %s3133_s19 = sphi %s3191_s19, %s4155_s19   ;;  %s3129_s18 = sphi %s3189_s18, %s4154_s18  }
   0x5   : > { %s30_s26 = sadd.s32 1, %s3145_s22  ;;  %s169_s27 = sadd.s32 1, %s3137_s20 }
   0x6   : > { %p32_p0 = scmp.ge.s32.totalorder %s30_s26, 3  ;;  %p179_p1 = scmp.ne.s32.totalorder %s3137_s20, %s3133_s19 }
   0x7   : > { %p180_p2 = scmp.eq.s32.totalorder %s2720_s24, 2  ;;  %p185_p3 = scmp.ne.s32.totalorder %s3133_s19, %s3129_s18 }
   0x8   : > { %s4160_s26 = smov (%p32_p0, %s30_s26), 0  ;;  %p186_p5 = scmp.eq.s32.totalorder %s2721_s25, 2 }
   0x9   : > { %p3229_p4 = por %p180_p2, %p179_p1  ;;  %s165_s29 = ssub.s32 %s3145_s22, %s4160_s26 }
   0xa   : > { %p2725_p6 = scmp.ge.s32.totalorder %s3149_s23, 1  ;;  %p167_p7 = scmp.eq.s32.totalorder %s165_s29, 0 }
   0xb   : > { %p3236_p8 = por %p186_p5, %p185_p3  ;;  %p248_p9 = scmp.lt.s32.totalorder %s3149_s23, 4 }
   0xc   : > { %s3242_s6 = scalar_select %p167_p7, %s3137_s20, %s169_s27  }
   0xd   : > { %p249_p10 = pnand %p2725_p6, %p248_p9 }
   0xf   : > { %252 = sbr.rel (%p249_p10) target bundleno = 694 (0x2b6), region = 40 }
  0x14   : > { %s2730_s7 = sshll.u32 %s3141_s21, 4  ;;  %v3151_v0 = vmov 0   ;;  %v3152_v33 = vmov 2   ;;  %s2727_s15 = sshll.u32 %s3141_s21, 2  ;;  %v3153_v50 = vmov 839922192  }
  0x15   : > { %3004 = vset.pattern.permute.xlu2 %v3151_v0  ;;  %3003 = vset.pattern.permute.xlu1 %v3151_v0  ;;  %p311_p11 = scmp.lt.s32.totalorder %s2730_s7, 47  ;;  %p304_p12 = scmp.lt.s32.totalorder %s2727_s15, 11  ;;  %v500_v51 = vunpack.c.l.s4 %v3153_v50 }
  0x16   : > { %3002 = vset.pattern.permute.xlu0 %v3151_v0  ;;  %p322_p13 = scmp.lt.s32.totalorder %s3141_s21, 2  ;;  %s293_s17 = sand.u32 1, %s3133_s19  }
  0x17   : > { %s4162_s7 = smov (!%p311_p11, %s2730_s7), 47  ;;  %s4164_s15 = smov (!%p304_p12, %s2727_s15), 11  ;;  %v3435_v55 = vunpack.c.0.s8 %v500_v51 }
  0x18   : > { %s2731_s8 = sshll.u32 %s4162_s7, 2  ;;  %s2898_s16 = sshll.u32 %s4164_s15, 4 }
  0x19   : > { %s3253_s11 = scalar_lea.vmem %s4113_s3, %s2731_s8  ;;  %s3320_s14 = scalar_lea.vmem %s4112_s2, %s2731_s8 }
  0x1a   : > { %v3256_v1 = vld [vmem:[%s3253_s11 + $0x10] sm:$0xf]  ;;  %v3259_v2 = vld [vmem:[%s3253_s11 + $0x8] sm:$0xf]  ;;  %v3262_v3 = vld [vmem:[%s3253_s11] sm:$0xf]  ;;  %s3403_s25 = scalar_lea.vmem %s4111_s1, %s2898_s16 }
  0x1b   : > { %532 = vperm.xlu2 %3004, %v3256_v1   ;;  %514 = vperm.xlu1 %3003, %v3259_v2   ;;  %v3268_v4 = vld [vmem:[%s3253_s11 + $0x14] sm:$0xf]  ;;  %v3271_v5 = vld [vmem:[%s3253_s11 + $0xc] sm:$0xf]  ;;  %v3274_v6 = vld [vmem:[%s3253_s11 + $0x4] sm:$0xf] }
  0x1c   : > { %496 = vperm.xlu0 %3002, %v3262_v3   ;;  %v3280_v7 = vld [vmem:[%s3253_s11 + $0x20] sm:$0xf]  ;;  %v3283_v8 = vld [vmem:[%s3253_s11 + $0x1c] sm:$0xf]  ;;  %v3286_v9 = vld [vmem:[%s3253_s11 + $0x18] sm:$0xf] }
  0x1d   : > { %v3292_v10 = vld [vmem:[%s3253_s11 + $0x2c] sm:$0xf]  ;;  %v3295_v11 = vld [vmem:[%s3253_s11 + $0x28] sm:$0xf]  ;;  %v3298_v12 = vld [vmem:[%s3253_s11 + $0x24] sm:$0xf] }
  0x1e   : > { %4134 = vst [vmem:[#allocation6_spill] sm:$0xff] %v3292_v10  ;;  %v3304_v13 = vld [vmem:[%s3253_s11 + $0x38] sm:$0xf]  ;;  %v3307_v14 = vld [vmem:[%s3253_s11 + $0x34] sm:$0xf]  ;;  %v3406_v36 = vld [vmem:[%s3403_s25] sm:$0xff] }
  0x1f   : > { %4135 = vst [vmem:[#allocation7_spill] sm:$0xff] %v3295_v11  ;;  %v3310_v15 = vld [vmem:[%s3253_s11 + $0x30] sm:$0xf]  ;;  %v3323_v16 = vld [vmem:[%s3320_s14 + $0x4] sm:$0xf]  ;;  %v4119_v37 = vunpack.c.1.s8 %v3406_v36  ;;  %v4120_v58 = vunpack.c.0.s8 %v3406_v36  ;;  %s3943_s27 = scalar_select %p322_p13, %s3141_s21, 2 }
  0x20   : > { %4136 = vst [vmem:[#allocation8_spill] sm:$0xff] %v3304_v13  ;;  %v3326_v17 = vld [vmem:[%s3320_s14] sm:$0xf]  ;;  %v3329_v18 = vld [vmem:[%s3253_s11 + $0x3c] sm:$0xf]  ;;  %v3410_v38 = vld [vmem:[%s3403_s25 + $0x10] sm:$0xff] }
  0x21   : > { %4137 = vst [vmem:[#allocation9_spill] sm:$0xff] %v3307_v14  ;;  %v3335_v19 = vld [vmem:[%s3320_s14 + $0x10] sm:$0xf]  ;;  %v3338_v20 = vld [vmem:[%s3320_s14 + $0xc] sm:$0xf]  ;;  %v4118_v40 = vunpack.c.0.s8 %v3410_v38  ;;  %v383_v41 = vshra.s32 %v4119_v37, 4  ;;  %v4116_v49 = vunpack.c.3.s8 %v3410_v38  ;;  %v4126_v37 = vunpack.c.2.s8 %v3406_v36  ;;  %s324_s8 = scalar_lea.vmem %s4114_s4, %s3943_s27 }
  0x22   : > { %4138 = vst [vmem:[#allocation10_spill] sm:$0xff] %v3326_v17  ;;  %v3341_v21 = vld [vmem:[%s3320_s14 + $0x8] sm:$0xf]  ;;  %v3347_v22 = vld [vmem:[%s3320_s14 + $0x1c] sm:$0xf]  ;;  %v3446_v62 = vld [vmem:[%s3403_s25 + $0x20] sm:$0xff] }
  0x23   : > { %541 = vperm.xlu2 %3004, %v3268_v4   ;;  %523 = vperm.xlu1 %3003, %v3271_v5   ;;  %v3350_v23 = vld [vmem:[%s3320_s14 + $0x18] sm:$0xf]  ;;  %v3353_v24 = vld [vmem:[%s3320_s14 + $0x14] sm:$0xf]  ;;  %v3359_v25 = vld [vmem:[%s3320_s14 + $0x28] sm:$0xf] }
  0x24   : > { %505 = vperm.xlu0 %3002, %v3274_v6   ;;  %v3362_v26 = vld [vmem:[%s3320_s14 + $0x24] sm:$0xf]  ;;  %v3365_v27 = vld [vmem:[%s3320_s14 + $0x20] sm:$0xf]  ;;  %v3371_v28 = vld [vmem:[%s3320_s14 + $0x34] sm:$0xf] }
  0x25   : > { %v3374_v29 = vld [vmem:[%s3320_s14 + $0x30] sm:$0xf]  ;;  %v3377_v30 = vld [vmem:[%s3320_s14 + $0x2c] sm:$0xf]  ;;  %v3383_v31 = vld [vmem:[%s3320_s14 + $0x3c] sm:$0xf] }
  0x26   : > { %v3386_v32 = vld [vmem:[%s3320_s14 + $0x38] sm:$0xf]  ;;  %v386_v42 = vshra.s32 %v4118_v40, 4  ;;  %v399_v43 = vand.u32 15, %v383_v41  ;;  %v389_v54 = vshra.s32 %v4116_v49, 4  ;;  %v4117_v41 = vunpack.c.2.s8 %v3446_v62  ;;  %v3459_v49 = vld [vmem:[%s3403_s25 + $0x30] sm:$0xff] }
  0x27   : > { %s2726_s24 = sshll.u32 %s293_s17, 5  ;;  %s2895_s27 = sshll.u32 %s3141_s21, 3 }
  0x28   : > { %v402_v47 = vand.u32 15, %v386_v42  ;;  %v415_v48 = vcvt.s32.f32 %v399_v43  ;;  %v382_v43 = vshra.s32 %v4120_v58, 4  ;;  %s2596_s7 = scalar_lea.hbm %s4115_s5, %s2895_s27  ;;  %s2583_s21 = scalar_lea.sflag [#allocation4], %s293_s17 }
  0x29   : > { %s2599_s10 = sshll.u32 %s2596_s7, 4  ;;  %s3091_s15 = scalar_lea.hbm %s4115_s5, 96  ;;  %s2600_s10 = int_to_ptr.hbm [resolvable:$true] %s2599_s10 }
  0x2a   : > { %v418_v52 = vcvt.s32.f32 %v402_v47  ;;  %v431_v53 = vpack.c.bf16 %v415_v48, %v415_v48 }
  0x2b   : > { %568 = vperm.xlu2 %3004, %v3280_v7   ;;  %559 = vperm.xlu1 %3003, %v3283_v8  }
  0x2c   : > { %550 = vperm.xlu0 %3002, %v3286_v9   ;;  %v434_v60 = vpack.c.bf16 %v418_v52, %v418_v52  ;;  %v639_v0 = vunpack.c.l.bf16 %v431_v53  ;;  %v4124_v52 = vunpack.c.1.s8 %v3410_v38 }
  0x2e   : > { %v642_v47 = vunpack.c.l.bf16 %v434_v60 }
  0x33   : > { %595 = vperm.xlu2 %3004, %v3292_v10   ;;  %586 = vperm.xlu1 %3003, %v3295_v11  }
  0x34   : > { %577 = vperm.xlu0 %3002, %v3298_v12  }
  0x3b   : > { %622 = vperm.xlu2 %3004, %v3304_v13   ;;  %613 = vperm.xlu1 %3003, %v3307_v14  }
  0x3c   : > { %604 = vperm.xlu0 %3002, %v3310_v15  }
  0x43   : > { %713 = vperm.xlu2 %3004, %v3323_v16   ;;  %704 = vperm.xlu1 %3003, %v3326_v17  }
  0x44   : > { %631 = vperm.xlu0 %3002, %v3329_v18  }
  0x4b   : > { %740 = vperm.xlu2 %3004, %v3335_v19   ;;  %731 = vperm.xlu1 %3003, %v3338_v20  }
  0x4c   : > { %722 = vperm.xlu0 %3002, %v3341_v21  }
  0x53   : > { %767 = vperm.xlu2 %3004, %v3347_v22   ;;  %758 = vperm.xlu1 %3003, %v3350_v23  }
  0x54   : > { %749 = vperm.xlu0 %3002, %v3353_v24  }
  0x5b   : > { %794 = vperm.xlu2 %3004, %v3359_v25   ;;  %785 = vperm.xlu1 %3003, %v3362_v26  }
  0x5c   : > { %776 = vperm.xlu0 %3002, %v3365_v27  }
  0x63   : > { %821 = vperm.xlu2 %3004, %v3371_v28   ;;  %812 = vperm.xlu1 %3003, %v3374_v29  }
  0x64   : > { %803 = vperm.xlu0 %3002, %v3377_v30  }
  0x6b   : > { %3005 = vset.pattern.permute.xlu2 %v3152_v33  ;;  %839 = vperm.xlu1 %3003, %v3383_v31  }
  0x6c   : > { %830 = vperm.xlu0 %3002, %v3386_v32   ;;  %927 = vperm.xlu2 %3005, %v3262_v3  }
  0x73   : > { %3007 = vset.pattern.permute.xlu1 %v3152_v33 }
  0x74   : > { %3006 = vset.pattern.permute.xlu0 %v3152_v33  ;;  %951 = vperm.xlu2 %3005, %v3271_v5   ;;  %v405_v33 = vand.u32 15, %v389_v54 }
  0x75   : > { %935 = vperm.xlu0 %3006, %v3274_v6   ;;  %943 = vperm.xlu1 %3007, %v3259_v2   ;;  %v533_v34 = vpop.permute.xlu2 %532 }
  0x76   : > { %v538_v61 = vperm.slane %v533_v34, %v3435_v55  ;;  %v421_v51 = vcvt.s32.f32 %v405_v33  ;;  %v392_v34 = vshra.s32 %v4117_v41, 4 }
  0x78   : > { %v658_v48 = vunpack.c.l.bf16 %v538_v61  ;;  %v408_v40 = vand.u32 15, %v392_v34 }
  0x7a   : > { %v674_v61 = vsub.f32 %v642_v47, %v658_v48  ;;  %v424_v34 = vcvt.s32.f32 %v408_v40 }
  0x7c   : > { %967 = vperm.xlu2 %3005, %v3268_v4  }
  0x7d   : > { %975 = vperm.xlu0 %3006, %v3286_v9   ;;  %959 = vperm.xlu1 %3007, %v3256_v1   ;;  %v3398_v35 = vpop.permute.xlu2 %541 }
  0x84   : > { %991 = vperm.xlu2 %3005, %v3280_v7  }
  0x85   : > { %999 = vperm.xlu0 %3006, %v3298_v12   ;;  %983 = vperm.xlu1 %3007, %v3283_v8   ;;  %v3415_v39 = vpop.permute.xlu2 %568 }
  0x8c   : > { %1015 = vperm.xlu2 %3005, %v3292_v10  }
  0x8d   : > { %1023 = vperm.xlu0 %3006, %v3310_v15   ;;  %1007 = vperm.xlu1 %3007, %v3295_v11   ;;  %v3425_v44 = vpop.permute.xlu2 %595  ;;  %v3427_v45 = vpop.permute.xlu1 %514 }
  0x8e   : > { %v3429_v46 = vpop.permute.xlu0 %496 }
  0x94   : > { %1039 = vperm.xlu2 %3005, %v3304_v13  }
  0x95   : > { %1047 = vperm.xlu0 %3006, %v3329_v18   ;;  %1031 = vperm.xlu1 %3007, %v3307_v14   ;;  %v3439_v56 = vpop.permute.xlu2 %622  ;;  %v3441_v57 = vpop.permute.xlu1 %523  ;;  %v690_v14 = vpack.c.bf16 %v674_v61, %v674_v61 }
  0x96   : > { %v506_v59 = vpop.permute.xlu0 %505 }
  0x97   : > { %v511_v63 = vperm.slane %v506_v59, %v3435_v55  ;;  %v850_v40 = vunpack.c.l.bf16 %v690_v14 }
  0x99   : > { %v655_v42 = vunpack.c.l.bf16 %v511_v63  ;;  %v398_v63 = vand.u32 15, %v382_v43  ;;  %v387_v43 = vshra.s32 %v4124_v52, 4 }
  0x9b   : > { %v671_v50 = vsub.f32 %v639_v0, %v655_v42  ;;  %v4125_v0 = vunpack.c.3.s8 %v3406_v36  ;;  %v4123_v42 = vunpack.c.1.s8 %v3459_v49  ;;  %v414_v58 = vcvt.s32.f32 %v398_v63 }
  0x9c   : > { %1127 = vperm.xlu2 %3005, %v3323_v16   ;;  %v384_v63 = vshra.s32 %v4126_v37, 4 }
  0x9d   : > { %v687_v53 = vpack.c.bf16 %v671_v50, %v671_v50  ;;  %1135 = vperm.xlu0 %3006, %v3341_v21   ;;  %1119 = vperm.xlu1 %3007, %v3326_v17   ;;  %v560_v54 = vpop.permute.xlu1 %559  ;;  %v714_v59 = vpop.permute.xlu2 %713  ;;  %v437_v50 = vpack.c.bf16 %v421_v51, %v421_v51  ;;  %v385_v47 = vshra.s32 %v4125_v0, 4  ;;  %v395_v48 = vshra.s32 %v4123_v42, 4 }
  0x9e   : > { %v3461_v60 = vpop.permute.xlu0 %550  ;;  %v719_v16 = vperm.slane %v714_v59, %v3435_v55  ;;  %v565_v21 = vperm.slane %v560_v54, %v3435_v55  ;;  %v403_v54 = vand.u32 15, %v387_v43  ;;  %v372_v43 = vunpack.c.2.s8 %v3410_v38 }
  0x9f   : > { %v847_v33 = vunpack.c.l.bf16 %v687_v53  ;;  %v645_v53 = vunpack.c.l.bf16 %v437_v50  ;;  %v502_v50 = vperm.slane %v3429_v46, %v3435_v55  ;;  %v411_v42 = vand.u32 15, %v395_v48 }
  0xa0   : > { %v863_v41 = vunpack.c.l.bf16 %v719_v16  ;;  %v661_v51 = vunpack.c.l.bf16 %v565_v21  ;;  %v374_v16 = vunpack.c.0.s8 %v3446_v62  ;;  %v401_v21 = vand.u32 15, %v385_v47 }
  0xa1   : > { %v419_v37 = vcvt.s32.f32 %v403_v54  ;;  %v400_v46 = vand.u32 15, %v384_v63  ;;  %v654_v13 = vunpack.c.l.bf16 %v502_v50  ;;  %v388_v14 = vshra.s32 %v372_v43, 4 }
  0xa2   : > { %v879_v17 = vmul.f32 %v863_v41, %v847_v33  ;;  %v430_v33 = vpack.c.bf16 %v414_v58, %v414_v58  ;;  %v677_v52 = vsub.f32 %v645_v53, %v661_v51  ;;  %v390_v58 = vshra.s32 %v374_v16, 4 }
  0xa3   : > { %v417_v10 = vcvt.s32.f32 %v401_v21  ;;  %v427_v47 = vcvt.s32.f32 %v411_v42  ;;  %v4131_v42 = vunpack.c.1.s8 %v3446_v62 }
  0xa4   : > { %v895_v59 = vpack.c.bf16 %v879_v17, %v879_v17  ;;  %1151 = vperm.xlu2 %3005, %v3335_v19   ;;  %v406_v54 = vand.u32 15, %v390_v58  ;;  %v520_v58 = vperm.slane %v3427_v45, %v3435_v55  ;;  %v547_v45 = vperm.slane %v3398_v35, %v3435_v55 }
  0xa5   : > { %1159 = vperm.xlu0 %3006, %v3353_v24   ;;  %1143 = vperm.xlu1 %3007, %v3338_v20   ;;  %v587_v41 = vpop.permute.xlu1 %586  ;;  %v741_v61 = vpop.permute.xlu2 %740  ;;  %v440_v24 = vpack.c.bf16 %v424_v34, %v424_v34  ;;  %v435_v34 = vpack.c.bf16 %v419_v37, %v419_v37  ;;  %v529_v37 = vperm.slane %v3441_v57, %v3435_v55  ;;  %v380_v35 = vunpack.c.2.s8 %v3459_v49 }
  0xa6   : > { %911 = vst [vmem:[#allocation2 + $0x10] sm:$0xf] %v895_v59  ;;  %v3482_v17 = vpop.permute.xlu0 %577  ;;  %v746_v19 = vperm.slane %v741_v61, %v3435_v55  ;;  %v592_v20 = vperm.slane %v587_v41, %v3435_v55  ;;  %v638_v59 = vunpack.c.l.bf16 %v430_v33  ;;  %v693_v61 = vpack.c.bf16 %v677_v52, %v677_v52 }
  0xa7   : > { %v648_v48 = vunpack.c.l.bf16 %v440_v24  ;;  %v416_v41 = vcvt.s32.f32 %v400_v46  ;;  %v377_v33 = vunpack.c.3.s8 %v3446_v62  ;;  %v3504_v46 = vcvt.s32.f32 %v406_v54 }
  0xa8   : > { %v866_v0 = vunpack.c.l.bf16 %v746_v19  ;;  %v664_v53 = vunpack.c.l.bf16 %v592_v20  ;;  %v670_v50 = vsub.f32 %v638_v59, %v654_v13  ;;  %v404_v19 = vand.u32 15, %v388_v14 }
  0xa9   : > { %v643_v20 = vunpack.c.l.bf16 %v435_v34  ;;  %v432_v13 = vpack.c.bf16 %v416_v41, %v416_v41  ;;  %v393_v57 = vshra.s32 %v377_v33, 4 }
  0xaa   : > { %v882_v11 = vmul.f32 %v866_v0, %v850_v40  ;;  %v853_v40 = vunpack.c.l.bf16 %v693_v61  ;;  %v686_v59 = vpack.c.bf16 %v670_v50, %v670_v50  ;;  %v420_v61 = vcvt.s32.f32 %v404_v19 }
  0xab   : > { %v640_v54 = vunpack.c.l.bf16 %v432_v13 }
  0xac   : > { %v898_v51 = vpack.c.bf16 %v882_v11, %v882_v11  ;;  %1175 = vperm.xlu2 %3005, %v3347_v22   ;;  %v433_v22 = vpack.c.bf16 %v417_v10, %v417_v10  ;;  %v391_v10 = vshra.s32 %v4131_v42, 4 }
  0xad   : > { %1183 = vperm.xlu0 %3006, %v3365_v27   ;;  %1167 = vperm.xlu1 %3007, %v3350_v23   ;;  %v614_v63 = vpop.permute.xlu1 %613  ;;  %v768_v0 = vpop.permute.xlu2 %767  ;;  %v443_v27 = vpack.c.bf16 %v427_v47, %v427_v47  ;;  %v680_v23 = vsub.f32 %v648_v48, %v664_v53  ;;  %v657_v47 = vunpack.c.l.bf16 %v529_v37 }
  0xae   : > { %914 = vst [vmem:[#allocation2 + $0x40] sm:$0xf] %v898_v51  ;;  %v3496_v52 = vpop.permute.xlu0 %604  ;;  %v773_v11 = vperm.slane %v768_v0, %v3435_v55  ;;  %v619_v21 = vperm.slane %v614_v63, %v3435_v55  ;;  %v641_v14 = vunpack.c.l.bf16 %v433_v22  ;;  %v656_v63 = vunpack.c.l.bf16 %v520_v58 }
  0xaf   : > { %v696_v48 = vpack.c.bf16 %v680_v23, %v680_v23  ;;  %v651_v53 = vunpack.c.l.bf16 %v443_v27  ;;  %v378_v0 = vunpack.c.0.s8 %v3459_v49  ;;  %v846_v22 = vunpack.c.l.bf16 %v686_v59 }
  0xb0   : > { %v869_v24 = vunpack.c.l.bf16 %v773_v11  ;;  %v667_v34 = vunpack.c.l.bf16 %v619_v21  ;;  %v407_v37 = vand.u32 15, %v391_v10  ;;  %v436_v23 = vpack.c.bf16 %v420_v61, %v420_v61 }
  0xb1   : > { %v856_v21 = vunpack.c.l.bf16 %v696_v48  ;;  %v659_v58 = vunpack.c.l.bf16 %v547_v45  ;;  %v438_v59 = vpack.c.bf16 %v3504_v46, %v3504_v46  ;;  %v409_v10 = vand.u32 15, %v393_v57 }
  0xb2   : > { %v885_v51 = vmul.f32 %v869_v24, %v853_v40  ;;  %v673_v40 = vsub.f32 %v641_v14, %v657_v47  ;;  %v644_v61 = vunpack.c.l.bf16 %v436_v23 }
  0xb3   : > { %v675_v45 = vsub.f32 %v643_v20, %v659_v58  ;;  %v583_v58 = vperm.slane %v3482_v17, %v3435_v55 }
  0xb4   : > { %v901_v41 = vpack.c.bf16 %v885_v51, %v885_v51  ;;  %1199 = vperm.xlu2 %3005, %v3359_v25   ;;  %v672_v51 = vsub.f32 %v640_v54, %v656_v63  ;;  %v689_v47 = vpack.c.bf16 %v673_v40, %v673_v40  ;;  %v3534_v54 = vcvt.s32.f32 %v409_v10 }
  0xb5   : > { %1207 = vperm.xlu0 %3006, %v3377_v30   ;;  %1191 = vperm.xlu1 %3007, %v3362_v26   ;;  %v795_v50 = vpop.permute.xlu2 %794  ;;  %v705_v11 = vpop.permute.xlu1 %704  ;;  %v556_v30 = vperm.slane %v3461_v60, %v3435_v55  ;;  %v683_v26 = vsub.f32 %v651_v53, %v667_v34  ;;  %v4139_v60 = vunpack.c.0.s8 %v3406_v36  ;;  %v3531_v53 = vshra.s32 %v380_v35, 4 }
  0xb6   : > { %917 = vst [vmem:[#allocation2 + $0x70] sm:$0xf] %v901_v41  ;;  %v3516_v19 = vpop.permute.xlu0 %631  ;;  %v800_v25 = vperm.slane %v795_v50, %v3435_v55  ;;  %v710_v27 = vperm.slane %v705_v11, %v3435_v55  ;;  %v423_v41 = vcvt.s32.f32 %v407_v37  ;;  %v394_v50 = vshra.s32 %v378_v0, 4 }
  0xb7   : > { %v660_v42 = vunpack.c.l.bf16 %v556_v30  ;;  %v446_v48 = vand.u32 15, %v4139_v60  ;;  %v699_v34 = vpack.c.bf16 %v683_v26, %v683_v26  ;;  %v688_v63 = vpack.c.bf16 %v672_v51, %v672_v51 }
  0xb8   : > { %v872_v24 = vunpack.c.l.bf16 %v800_v25  ;;  %v862_v13 = vunpack.c.l.bf16 %v710_v27  ;;  %v439_v27 = vpack.c.bf16 %v423_v41, %v423_v41  ;;  %v410_v40 = vand.u32 15, %v394_v50 }
  0xb9   : > { %v849_v20 = vunpack.c.l.bf16 %v689_v47  ;;  %v676_v26 = vsub.f32 %v644_v61, %v660_v42  ;;  %v574_v41 = vperm.slane %v3415_v39, %v3435_v55  ;;  %v848_v50 = vunpack.c.l.bf16 %v688_v63 }
  0xba   : > { %v888_v11 = vmul.f32 %v872_v24, %v856_v21  ;;  %v878_v14 = vmul.f32 %v862_v13, %v846_v22  ;;  %v381_v22 = vunpack.c.3.s8 %v3459_v49  ;;  %v462_v13 = vcvt.s32.f32 %v446_v48 }
  0xbb   : > { %v647_v60 = vunpack.c.l.bf16 %v439_v27  ;;  %v663_v17 = vunpack.c.l.bf16 %v583_v58  ;;  %v646_v39 = vunpack.c.l.bf16 %v438_v59  ;;  %v662_v63 = vunpack.c.l.bf16 %v574_v41 }
  0xbc   : > { %v904_v46 = vpack.c.bf16 %v888_v11, %v888_v11  ;;  %v894_v57 = vpack.c.bf16 %v878_v14, %v878_v14  ;;  %1223 = vperm.xlu2 %3005, %v3371_v28   ;;  %v691_v14 = vpack.c.bf16 %v675_v45, %v675_v45  ;;  %v397_v47 = vshra.s32 %v381_v22, 4 }
  0xbd   : > { %1231 = vperm.xlu0 %3006, %v3386_v32   ;;  %1215 = vperm.xlu1 %3007, %v3374_v29   ;;  %v822_v37 = vpop.permute.xlu2 %821  ;;  %v732_v25 = vpop.permute.xlu1 %731  ;;  %v859_v29 = vunpack.c.l.bf16 %v699_v34  ;;  %v412_v45 = vand.u32 15, %v3531_v53  ;;  %v678_v41 = vsub.f32 %v646_v39, %v662_v63 }
  0xbe   : > { %920 = vst [vmem:[#allocation2 + $0xa0] sm:$0xf] %v904_v46  ;;  %v723_v23 = vpop.permute.xlu0 %722  ;;  %v827_v30 = vperm.slane %v822_v37, %v3435_v55  ;;  %v737_v21 = vperm.slane %v732_v25, %v3435_v55  ;;  %v426_v46 = vcvt.s32.f32 %v410_v40  ;;  %v692_v37 = vpack.c.bf16 %v676_v26, %v676_v26 }
  0xbf   : > { %910 = vst [vmem:[#allocation2] sm:$0xf] %v894_v57  ;;  %v728_v24 = vperm.slane %v723_v23, %v3435_v55  ;;  %v478_v57 = vpack.c.bf16 %v462_v13, %v462_v13  ;;  %v3154_v23 = vmov 1   ;;  %v851_v40 = vunpack.c.l.bf16 %v691_v14 }
  0xc0   : > { %v875_v10 = vunpack.c.l.bf16 %v827_v30  ;;  %v865_v51 = vunpack.c.l.bf16 %v737_v21  ;;  %v441_v21 = vpack.c.bf16 %v3534_v54, %v3534_v54  ;;  %v610_v54 = vperm.slane %v3496_v52, %v3435_v55 }
  0xc1   : > { %v864_v11 = vunpack.c.l.bf16 %v728_v24  ;;  %v442_v24 = vpack.c.bf16 %v426_v46, %v426_v46 }
  0xc2   : > { %v891_v42 = vmul.f32 %v875_v10, %v859_v29  ;;  %v881_v61 = vmul.f32 %v865_v51, %v849_v20  ;;  %v413_v20 = vand.u32 15, %v397_v47  ;;  %v1054_v29 = vunpack.c.l.bf16 %v478_v57 }
  0xc3   : > { %v880_v48 = vmul.f32 %v864_v11, %v848_v50  ;;  %v852_v10 = vunpack.c.l.bf16 %v692_v37  ;;  %v679_v51 = vsub.f32 %v647_v60, %v663_v17  ;;  %v428_v47 = vcvt.s32.f32 %v412_v45 }
  0xc4   : > { %v907_v34 = vpack.c.bf16 %v891_v42, %v891_v42  ;;  %v897_v25 = vpack.c.bf16 %v881_v61, %v881_v61  ;;  %3008 = vset.pattern.permute.xlu2 %v3154_v23  ;;  %v429_v42 = vcvt.s32.f32 %v413_v20  ;;  %v650_v57 = vunpack.c.l.bf16 %v442_v24 }
  0xc5   : > { %v896_v30 = vpack.c.bf16 %v880_v48, %v880_v48  ;;  %3009 = vset.pattern.permute.xlu0 %v3154_v23  ;;  %1239 = vperm.xlu1 %3007, %v3383_v31   ;;  %v759_v27 = vpop.permute.xlu1 %758  ;;  %v695_v48 = vpack.c.bf16 %v679_v51, %v679_v51  ;;  %v666_v60 = vunpack.c.l.bf16 %v610_v54  ;;  %v694_v17 = vpack.c.bf16 %v678_v41, %v678_v41 }
  0xc6   : > { %923 = vst [vmem:[#allocation2 + $0xd0] sm:$0xf] %v907_v34  ;;  %1467 = vperm.xlu0 %3009, %v3274_v6   ;;  %v750_v26 = vpop.permute.xlu0 %749  ;;  %1459 = vperm.xlu2 %3008, %v3262_v3   ;;  %v764_v59 = vperm.slane %v759_v27, %v3435_v55  ;;  %v928_v53 = vpop.permute.xlu2 %927  ;;  %v601_v3 = vperm.slane %v3425_v44, %v3435_v55  ;;  %v649_v52 = vunpack.c.l.bf16 %v441_v21 }
  0xc7   : > { %912 = vst [vmem:[#allocation2 + $0x20] sm:$0xf] %v896_v30  ;;  %v755_v13 = vperm.slane %v750_v26, %v3435_v55  ;;  %v933_v58 = vperm.slane %v928_v53, %v3435_v55  ;;  %v444_v30 = vpack.c.bf16 %v428_v47, %v428_v47  ;;  %v445_v27 = vpack.c.bf16 %v429_v42, %v429_v42 }
  0xc8   : > { %913 = vst [vmem:[#allocation2 + $0x30] sm:$0xf] %v897_v25  ;;  %v868_v6 = vunpack.c.l.bf16 %v764_v59  ;;  %v665_v34 = vunpack.c.l.bf16 %v601_v3  ;;  %v855_v21 = vunpack.c.l.bf16 %v695_v48  ;;  %v682_v20 = vsub.f32 %v650_v57, %v666_v60 }
  0xc9   : > { %v867_v50 = vunpack.c.l.bf16 %v755_v13  ;;  %v1070_v11 = vunpack.c.l.bf16 %v933_v58  ;;  %v637_v26 = vperm.slane %v3516_v19, %v3435_v55  ;;  %v854_v59 = vunpack.c.l.bf16 %v694_v17 }
  0xca   : > { %v884_v14 = vmul.f32 %v868_v6, %v852_v10  ;;  %v681_v53 = vsub.f32 %v649_v52, %v665_v34  ;;  %v653_v10 = vunpack.c.l.bf16 %v445_v27 }
  0xcb   : > { %v883_v61 = vmul.f32 %v867_v50, %v851_v40  ;;  %v3563_v46 = vsub.f32 %v1054_v29, %v1070_v11  ;;  %v698_v29 = vpack.c.bf16 %v682_v20, %v682_v20  ;;  %v669_v51 = vunpack.c.l.bf16 %v637_v26 }
  0xcc   : > { %v900_v37 = vpack.c.bf16 %v884_v14, %v884_v14  ;;  %v697_v6 = vpack.c.bf16 %v681_v53, %v681_v53 }
  0xcd   : > { %v899_v25 = vpack.c.bf16 %v883_v61, %v883_v61  ;;  %3010 = vset.pattern.permute.xlu1 %v3154_v23  ;;  %v786_v39 = vpop.permute.xlu1 %785  ;;  %v858_v47 = vunpack.c.l.bf16 %v698_v29  ;;  %v685_v42 = vsub.f32 %v653_v10, %v669_v51 }
  0xce   : > { %916 = vst [vmem:[#allocation2 + $0x60] sm:$0xf] %v900_v37  ;;  %1507 = vperm.xlu0 %3009, %v3286_v9   ;;  %v777_v44 = vpop.permute.xlu0 %776  ;;  %1483 = vperm.xlu2 %3008, %v3271_v5   ;;  %v791_v63 = vperm.slane %v786_v39, %v3435_v55  ;;  %v3569_v45 = vpop.permute.xlu2 %951  ;;  %v628_v5 = vperm.slane %v3439_v56, %v3435_v55  ;;  %v857_v48 = vunpack.c.l.bf16 %v697_v6 }
  0xcf   : > { %915 = vst [vmem:[#allocation2 + $0x50] sm:$0xf] %v899_v25  ;;  %v782_v40 = vperm.slane %v777_v44, %v3435_v55  ;;  %1475 = vperm.xlu1 %3010, %v3259_v2   ;;  %v652_v2 = vunpack.c.l.bf16 %v444_v30  ;;  %v701_v17 = vpack.c.bf16 %v685_v42, %v685_v42  ;;  %v4140_v30 = vunpack.c.1.s8 %v3406_v36 }
  0xd0   : > { %v871_v9 = vunpack.c.l.bf16 %v791_v63  ;;  %v668_v41 = vunpack.c.l.bf16 %v628_v5 }
  0xd1   : > { %v870_v24 = vunpack.c.l.bf16 %v782_v40  ;;  %v447_v27 = vand.u32 15, %v4140_v30  ;;  %v861_v40 = vunpack.c.l.bf16 %v701_v17  ;;  %v4146_v17 = vunpack.c.3.s8 %v3410_v38 }
  0xd2   : > { %v887_v13 = vmul.f32 %v871_v9, %v855_v21  ;;  %v684_v57 = vsub.f32 %v652_v2, %v668_v41 }
  0xd3   : > { %v886_v58 = vmul.f32 %v870_v24, %v854_v59  ;;  %v463_v53 = vcvt.s32.f32 %v447_v27  ;;  %v4141_v24 = vld [vmem:[#allocation6_spill] sm:$0xff] }
  0xd4   : > { %v903_v54 = vpack.c.bf16 %v887_v13, %v887_v13  ;;  %v4147_v27 = vld [vmem:[#allocation10_spill] sm:$0xff] }
  0xd5   : > { %v902_v3 = vpack.c.bf16 %v886_v58, %v886_v58  ;;  %v813_v50 = vpop.permute.xlu1 %812  ;;  %v479_v29 = vpack.c.bf16 %v463_v53, %v463_v53 }
  0xd6   : > { %919 = vst [vmem:[#allocation2 + $0x90] sm:$0xf] %v903_v54  ;;  %1531 = vperm.xlu0 %3009, %v3298_v12   ;;  %v804_v19 = vpop.permute.xlu0 %803  ;;  %1499 = vperm.xlu2 %3008, %v3268_v4   ;;  %v818_v56 = vperm.slane %v813_v50, %v3435_v55  ;;  %v3580_v11 = vpop.permute.xlu2 %967  ;;  %v700_v4 = vpack.c.bf16 %v684_v57, %v684_v57  ;;  %v4143_v54 = vunpack.c.0.s8 %v3410_v38 }
  0xd7   : > { %918 = vst [vmem:[#allocation2 + $0x80] sm:$0xf] %v902_v3  ;;  %v809_v14 = vperm.slane %v804_v19, %v3435_v55  ;;  %1491 = vperm.xlu1 %3010, %v3256_v1   ;;  %v1055_v2 = vunpack.c.l.bf16 %v479_v29  ;;  %v3155_v19 = vmov 3   ;;  %v4150_v29 = vunpack.c.3.s8 %v3406_v36 }
  0xd8   : > { %v874_v61 = vunpack.c.l.bf16 %v818_v56  ;;  %v860_v20 = vunpack.c.l.bf16 %v700_v4  ;;  %v450_v6 = vand.u32 15, %v4143_v54  ;;  %v4144_v56 = vld [vmem:[#allocation8_spill] sm:$0xff] }
  0xd9   : > { %v873_v60 = vunpack.c.l.bf16 %v809_v14 }
  0xda   : > { %v890_v37 = vmul.f32 %v874_v61, %v858_v47  ;;  %v466_v3 = vcvt.s32.f32 %v450_v6  ;;  %v4145_v61 = vld [vmem:[#allocation9_spill] sm:$0xff] }
  0xdb   : > { %v889_v12 = vmul.f32 %v873_v60, %v857_v48 }
  0xdc   : > { %v906_v52 = vpack.c.bf16 %v890_v37, %v890_v37  ;;  %v482_v37 = vpack.c.bf16 %v466_v3, %v466_v3 }
  0xdd   : > { %v905_v34 = vpack.c.bf16 %v889_v12, %v889_v12  ;;  %v840_v25 = vpop.permute.xlu1 %839 }
  0xde   : > { %922 = vst [vmem:[#allocation2 + $0xc0] sm:$0xf] %v906_v52  ;;  %1555 = vperm.xlu0 %3009, %v3310_v15   ;;  %v831_v39 = vpop.permute.xlu0 %830  ;;  %1523 = vperm.xlu2 %3008, %v3280_v7   ;;  %v845_v1 = vperm.slane %v840_v25, %v3435_v55  ;;  %v3587_v44 = vpop.permute.xlu2 %991  ;;  %v453_v52 = vand.u32 15, %v4146_v17  ;;  %v1058_v25 = vunpack.c.l.bf16 %v482_v37 }
  0xdf   : > { %921 = vst [vmem:[#allocation2 + $0xb0] sm:$0xf] %v905_v34  ;;  %v836_v63 = vperm.slane %v831_v39, %v3435_v55  ;;  %1515 = vperm.xlu1 %3010, %v3283_v8   ;;  %v4142_v8 = vld [vmem:[#allocation7_spill] sm:$0xff] }
  0xe0   : > { %v877_v21 = vunpack.c.l.bf16 %v845_v1  ;;  %v469_v1 = vcvt.s32.f32 %v453_v52 }
  0xe1   : > { %v876_v26 = vunpack.c.l.bf16 %v836_v63 }
  0xe2   : > { %v893_v9 = vmul.f32 %v877_v21, %v861_v40 }
  0xe3   : > { %v892_v59 = vmul.f32 %v876_v26, %v860_v20 }
  0xe4   : > { %v909_v7 = vpack.c.bf16 %v893_v9, %v893_v9  ;;  %v4148_v9 = vunpack.c.2.s8 %v3446_v62 }
  0xe5   : > { %v908_v5 = vpack.c.bf16 %v892_v59, %v892_v59  ;;  %v2864_v34 = vld [vmem:[#allocation2 + $0xc0] sm:$0xf] }
  0xe6   : > { %925 = vst [vmem:[#allocation2 + $0xf0] sm:$0xf] %v909_v7  ;;  %1579 = vperm.xlu0 %3009, %v3329_v18   ;;  %1547 = vperm.xlu2 %3008, %v4141_v24   ;;  %v3595_v13 = vpop.permute.xlu2 %1015  ;;  %v456_v59 = vand.u32 15, %v4148_v9  ;;  %v2929_v6 = vld [vmem:[#allocation2 + $0xac] sm:$0xf0] }
  0xe7   : > { %924 = vst [vmem:[#allocation2 + $0xe0] sm:$0xf] %v908_v5  ;;  %1539 = vperm.xlu1 %3010, %v4142_v8   ;;  %v936_v58 = vpop.permute.xlu0 %935  ;;  %v3598_v10 = vpop.permute.xlu1 %943  ;;  %v485_v5 = vpack.c.bf16 %v469_v1, %v469_v1  ;;  %v4149_v8 = vunpack.c.2.s8 %v3406_v36 }
  0xe8   : > { %v941_v51 = vperm.slane %v936_v58, %v3435_v55  ;;  %v472_v54 = vcvt.s32.f32 %v456_v59 }
  0xe9   : > { %v1061_v3 = vunpack.c.l.bf16 %v485_v5  ;;  %v2832_v5 = vld [vmem:[#allocation2 + $0x80] sm:$0xf] }
  0xea   : > { %v1071_v41 = vunpack.c.l.bf16 %v941_v51  ;;  %v449_v51 = vand.u32 15, %v4150_v29  ;;  %v488_v52 = vpack.c.bf16 %v472_v54, %v472_v54  ;;  %v452_v54 = vand.u32 15, %v372_v43 }
  0xec   : > { %v1087_v42 = vsub.f32 %v1055_v2, %v1071_v41  ;;  %v465_v17 = vcvt.s32.f32 %v449_v51 }
  0xed   : > { %v2937_v50 = vld [vmem:[#allocation2 + $0xec] sm:$0xf0] }
  0xee   : > { %3012 = vset.pattern.permute.xlu0 %v3155_v19  ;;  %1571 = vperm.xlu2 %3008, %v4144_v56   ;;  %v3605_v14 = vpop.permute.xlu2 %1039  ;;  %v2880_v47 = vld [vmem:[#allocation2 + $0xe0] sm:$0xf]  ;;  %v1103_v4 = vpack.c.bf16 %v1087_v42, %v1087_v42 }
  0xef   : > { %1563 = vperm.xlu1 %3010, %v4145_v61   ;;  %1979 = vperm.xlu0 %3012, %v3329_v18   ;;  %v3609_v48 = vpop.permute.xlu0 %975  ;;  %v960_v57 = vpop.permute.xlu1 %959  ;;  %v2881_v60 = vor.u32 %v2937_v50, %v2880_v47  ;;  %v2933_v18 = vld [vmem:[#allocation2 + $0xcc] sm:$0xf0]  ;;  %v2848_v42 = vld [vmem:[#allocation2 + $0xa0] sm:$0xf]  ;;  %v4151_v61 = vunpack.c.1.s8 %v3410_v38 }
  0xf0   : > { %v965_v12 = vperm.slane %v960_v57, %v3435_v55  ;;  %v1247_v30 = vunpack.c.l.bf16 %v1103_v4  ;;  %v2865_v26 = vor.u32 %v2933_v18, %v2864_v34  ;;  %v4152_v4 = vunpack.c.1.s8 %v3459_v49 }
  0xf1   : > { %2502 = vmatpush.bf16.xpose.msra.mxu0 %v2881_v60  ;;  %v451_v57 = vand.u32 15, %v4151_v61  ;;  %v949_v18 = vperm.slane %v3598_v10, %v3435_v55  ;;  %v457_v10 = vand.u32 15, %v377_v33 }
  0xf2   : > { %v1074_v39 = vunpack.c.l.bf16 %v965_v12  ;;  %v2849_v12 = vor.u32 %v2929_v6, %v2848_v42  ;;  %v459_v34 = vand.u32 15, %v4152_v4  ;;  %v3044_v6 = vld [vmem:[%s3253_s11 + $0x28] sm:$0xf]  ;;  %v1102_v42 = vpack.c.bf16 %v3563_v46, %v3563_v46 }
  0xf4   : > { %v1090_v53 = vsub.f32 %v1058_v25, %v1074_v39 }
  0xf6   : > { %3011 = vset.pattern.permute.xlu2 %v3155_v19  ;;  %v1128_v63 = vpop.permute.xlu2 %1127  ;;  %v1106_v2 = vpack.c.bf16 %v1090_v53, %v1090_v53  ;;  %v1064_v53 = vunpack.c.l.bf16 %v488_v52 }
  0xf7   : > { %1651 = vperm.xlu1 %3010, %v4147_v27   ;;  %1955 = vperm.xlu0 %3012, %v3310_v15   ;;  %v3617_v40 = vpop.permute.xlu0 %999  ;;  %v1133_v21 = vperm.slane %v1128_v63, %v3435_v55  ;;  %v984_v20 = vpop.permute.xlu1 %983  ;;  %v448_v15 = vand.u32 15, %v4149_v8  ;;  %v454_v8 = vand.u32 15, %v374_v16 }
  0xf8   : > { %1971 = vperm.xlu2 %3011, %v4144_v56   ;;  %v989_v24 = vperm.slane %v984_v20, %v3435_v55  ;;  %v1250_v25 = vunpack.c.l.bf16 %v1106_v2  ;;  %v957_v20 = vperm.slane %v3569_v45, %v3435_v55  ;;  %v973_v45 = vperm.slane %v3580_v11, %v3435_v55 }
  0xf9   : > { %v1263_v7 = vunpack.c.l.bf16 %v1133_v21  ;;  %2503 = vmatpush.bf16.xpose.msra.mxu0 %v2865_v26  ;;  %v464_v56 = vcvt.s32.f32 %v448_v15  ;;  %v481_v21 = vpack.c.bf16 %v465_v17, %v465_v17  ;;  %v475_v26 = vcvt.s32.f32 %v459_v34 }
  0xfa   : > { %v1077_v50 = vunpack.c.l.bf16 %v989_v24  ;;  %v2925_v24 = vld [vmem:[#allocation2 + $0x8c] sm:$0xf0]  ;;  %v1073_v33 = vunpack.c.l.bf16 %v957_v20  ;;  %v470_v61 = vcvt.s32.f32 %v454_v8  ;;  %v468_v17 = vcvt.s32.f32 %v452_v54 }
  0xfb   : > { %v1279_v58 = vmul.f32 %v1263_v7, %v1247_v30  ;;  %v480_v63 = vpack.c.bf16 %v464_v56, %v464_v56  ;;  %v467_v30 = vcvt.s32.f32 %v451_v57  ;;  %v2833_v56 = vor.u32 %v2925_v24, %v2832_v5 }
  0xfc   : > { %v1093_v39 = vsub.f32 %v1061_v3, %v1077_v50  ;;  %v1057_v3 = vunpack.c.l.bf16 %v481_v21  ;;  %v491_v50 = vpack.c.bf16 %v475_v26, %v475_v26  ;;  %v473_v57 = vcvt.s32.f32 %v457_v10  ;;  %v3672_v26 = vld [vmem:[%s3320_s14 + $0x2c] sm:$0xf] }
  0xfd   : > { %v1295_v41 = vpack.c.bf16 %v1279_v58, %v1279_v58  ;;  %v1056_v15 = vunpack.c.l.bf16 %v480_v63  ;;  %v1072_v58 = vunpack.c.l.bf16 %v949_v18  ;;  %v483_v51 = vpack.c.bf16 %v467_v30, %v467_v30 }
  0xfe   : > { %v1152_v47 = vpop.permute.xlu2 %1151  ;;  %v1109_v9 = vpack.c.bf16 %v1093_v39, %v1093_v39  ;;  %v1089_v4 = vsub.f32 %v1057_v3, %v1073_v33  ;;  %v1067_v39 = vunpack.c.l.bf16 %v491_v50  ;;  %v3665_v63 = vpack.c.bf16 %v473_v57, %v473_v57  ;;  %v3687_v3 = vld [vmem:[%s3403_s25 + $0x8] sm:$0xff] }
  0xff   : > { %1311 = vst [vmem:[#allocation2 + $0x18] sm:$0xf] %v1295_v41  ;;  %3013 = vset.pattern.permute.xlu1 %v3155_v19  ;;  %2155 = vperm.xlu0 %3012, %v3371_v28   ;;  %v3632_v60 = vpop.permute.xlu0 %1023  ;;  %v1157_v36 = vperm.slane %v1152_v47, %v3435_v55  ;;  %v1008_v37 = vpop.permute.xlu1 %1007  ;;  %v4153_v21 = vunpack.c.1.s8 %v3446_v62  ;;  %v997_v10 = vperm.slane %v3587_v44, %v3435_v55 }
 0x100   : > { %2171 = vperm.xlu2 %3011, %v3383_v31   ;;  %2163 = vperm.xlu1 %3013, %v3386_v32   ;;  %v1013_v28 = vperm.slane %v1008_v37, %v3435_v55  ;;  %v1253_v11 = vunpack.c.l.bf16 %v1109_v9  ;;  %v1059_v37 = vunpack.c.l.bf16 %v483_v51  ;;  %v1105_v5 = vpack.c.bf16 %v1089_v4, %v1089_v4 }
 0x101   : > { %v1266_v1 = vunpack.c.l.bf16 %v1157_v36  ;;  %2504 = vmatpush.bf16.xpose.msra.mxu0 %v2849_v12  ;;  %v1088_v36 = vsub.f32 %v1056_v15, %v1072_v58  ;;  %v1075_v12 = vunpack.c.l.bf16 %v973_v45  ;;  %v455_v20 = vand.u32 15, %v4153_v21 }
 0x102   : > { %v1080_v7 = vunpack.c.l.bf16 %v1013_v28  ;;  %v1246_v28 = vunpack.c.l.bf16 %v1102_v42  ;;  %v981_v45 = vperm.slane %v3609_v48, %v3435_v55  ;;  %v1078_v42 = vunpack.c.l.bf16 %v997_v10 }
 0x103   : > { %v1282_v27 = vmul.f32 %v1266_v1, %v1250_v25  ;;  %v1104_v46 = vpack.c.bf16 %v1088_v36, %v1088_v36  ;;  %v1091_v30 = vsub.f32 %v1059_v37, %v1075_v12  ;;  %v471_v50 = vcvt.s32.f32 %v455_v20 }
 0x104   : > { %v1096_v47 = vsub.f32 %v1064_v53, %v1080_v7  ;;  %v2921_v7 = vld [vmem:[#allocation2 + $0x6c] sm:$0xf0]  ;;  %v1333_v36 = vunpack.c.3.s8 %v3687_v3  ;;  %v1249_v37 = vunpack.c.l.bf16 %v1105_v5  ;;  %v1076_v12 = vunpack.c.l.bf16 %v981_v45 }
 0x105   : > { %v1298_v59 = vpack.c.bf16 %v1282_v27, %v1282_v27  ;;  %v3667_v27 = vpack.c.bf16 %v468_v17, %v468_v17  ;;  %v1248_v51 = vunpack.c.l.bf16 %v1104_v46  ;;  %v1107_v44 = vpack.c.bf16 %v1091_v30, %v1091_v30 }
 0x106   : > { %v1176_v29 = vpop.permute.xlu2 %1175  ;;  %v1112_v34 = vpack.c.bf16 %v1096_v47, %v1096_v47  ;;  %v460_v47 = vand.u32 15, %v380_v35  ;;  %v3048_v35 = vld [vmem:[%s3253_s11 + $0x20] sm:$0xf]  ;;  %v1021_v46 = vperm.slane %v3595_v13, %v3435_v55  ;;  %v1005_v13 = vperm.slane %v3617_v40, %v3435_v55 }
 0x107   : > { %1314 = vst [vmem:[#allocation2 + $0x48] sm:$0xf] %v1298_v59  ;;  %1939 = vperm.xlu0 %3012, %v3044_v6   ;;  %v3653_v2 = vpop.permute.xlu0 %1047  ;;  %v1181_v16 = vperm.slane %v1176_v29, %v3435_v55  ;;  %v1032_v41 = vpop.permute.xlu1 %1031  ;;  %v2784_v40 = vld [vmem:[#allocation2 + $0x20] sm:$0xf] }
 0x108   : > { %3015 = vset.pattern.permute.xlu2 %v3154_v23  ;;  %3014 = vset.pattern.permute.xlu1 %v3154_v23  ;;  %v1037_v43 = vperm.slane %v1032_v41, %v3435_v55  ;;  %v1256_v15 = vunpack.c.l.bf16 %v1112_v34  ;;  %v3047_v41 = vld [vmem:[%s3253_s11 + $0x34] sm:$0xf]  ;;  %v2800_v34 = vld [vmem:[#allocation2 + $0x40] sm:$0xf]  ;;  %v1081_v10 = vunpack.c.l.bf16 %v1021_v46 }
 0x109   : > { %v1269_v38 = vunpack.c.l.bf16 %v1181_v16  ;;  %1771 = vperm.xlu2 %3015, %v3383_v31   ;;  %1763 = vperm.xlu1 %3014, %v3386_v32   ;;  %v2816_v31 = vld [vmem:[#allocation2 + $0x60] sm:$0xf]  ;;  %v3663_v32 = vpack.c.bf16 %v470_v61, %v470_v61  ;;  %v3046_v16 = vld [vmem:[%s3320_s14 + $0x30] sm:$0xf] }
 0x10a   : > { %2505 = vmatpush.bf16.xpose.msra.mxu0 %v2833_v56  ;;  %v1083_v1 = vunpack.c.l.bf16 %v1037_v43  ;;  %v2817_v62 = vor.u32 %v2921_v7, %v2816_v31  ;;  %v2917_v43 = vld [vmem:[#allocation2 + $0x4c] sm:$0xf0] }
 0x10b   : > { %v1285_v52 = vmul.f32 %v1269_v38, %v1253_v11  ;;  %v1062_v33 = vunpack.c.l.bf16 %v3663_v32  ;;  %v1060_v11 = vunpack.c.l.bf16 %v3667_v27  ;;  %v2801_v32 = vor.u32 %v2917_v43, %v2800_v34 }
 0x10c   : > { %v1099_v58 = vsub.f32 %v1067_v39, %v1083_v1  ;;  %v3694_v39 = vpack.c.bf16 %v471_v50, %v471_v50 }
 0x10d   : > { %v1301_v25 = vpack.c.bf16 %v1285_v52, %v1285_v52  ;;  %v1094_v21 = vsub.f32 %v1062_v33, %v1078_v42  ;;  %v1045_v42 = vperm.slane %v3605_v14, %v3435_v55 }
 0x10e   : > { %v1200_v18 = vpop.permute.xlu2 %1199  ;;  %v1115_v61 = vpack.c.bf16 %v1099_v58, %v1099_v58 }
 0x10f   : > { %1317 = vst [vmem:[#allocation2 + $0x78] sm:$0xf] %v1301_v25  ;;  %2139 = vperm.xlu0 %3012, %v3672_v26   ;;  %v1136_v9 = vpop.permute.xlu0 %1135  ;;  %v1205_v59 = vperm.slane %v1200_v18, %v3435_v55  ;;  %v1120_v53 = vpop.permute.xlu1 %1119  ;;  %v1251_v25 = vunpack.c.l.bf16 %v1107_v44  ;;  %v458_v18 = vand.u32 15, %v378_v0  ;;  %v1065_v0 = vunpack.c.l.bf16 %v3665_v63 }
 0x110   : > { %v1141_v24 = vperm.slane %v1136_v9, %v3435_v55  ;;  %v1125_v8 = vperm.slane %v1120_v53, %v3435_v55  ;;  %v1259_v20 = vunpack.c.l.bf16 %v1115_v61  ;;  %v1092_v53 = vsub.f32 %v1060_v11, %v1076_v12 }
 0x111   : > { %v1272_v29 = vunpack.c.l.bf16 %v1205_v59  ;;  %3017 = vset.pattern.permute.xlu2 %v3155_v19  ;;  %3016 = vset.pattern.permute.xlu1 %v3155_v19  ;;  %v1349_v59 = vshra.s32 %v1333_v36, 4  ;;  %v1110_v45 = vpack.c.bf16 %v1094_v21, %v1094_v21  ;;  %v1079_v63 = vunpack.c.l.bf16 %v1005_v13 }
 0x112   : > { %v1264_v54 = vunpack.c.l.bf16 %v1141_v24  ;;  %v1262_v6 = vunpack.c.l.bf16 %v1125_v8  ;;  %2147 = vperm.xlu2 %3017, %v3046_v16   ;;  %1963 = vperm.xlu1 %3016, %v3047_v41   ;;  %v476_v24 = vcvt.s32.f32 %v460_v47  ;;  %v1108_v44 = vpack.c.bf16 %v1092_v53, %v1092_v53  ;;  %v3716_v47 = vld [vmem:[%s3320_s14 + $0x24] sm:$0xf]  ;;  %v2909_v53 = vld [vmem:[#allocation2 + $0xc] sm:$0xf0] }
 0x113   : > { %v1288_v56 = vmul.f32 %v1272_v29, %v1256_v15  ;;  %2506 = vmatpush.bf16.xpose.msra.mxu0 %v2817_v62  ;;  %v3049_v62 = vld [vmem:[%s3320_s14 + $0x34] sm:$0xf]  ;;  %v1063_v15 = vunpack.c.l.bf16 %v3694_v39  ;;  %v1365_v41 = vand.u32 15, %v1349_v59  ;;  %v461_v11 = vand.u32 15, %v381_v22 }
 0x114   : > { %v1280_v48 = vmul.f32 %v1264_v54, %v1248_v51  ;;  %v1278_v38 = vmul.f32 %v1262_v6, %v1246_v28  ;;  %v2913_v51 = vld [vmem:[#allocation2 + $0x2c] sm:$0xf0]  ;;  %v474_v54 = vcvt.s32.f32 %v458_v18  ;;  %v1097_v43 = vsub.f32 %v1065_v0, %v1081_v10 }
 0x115   : > { %v1304_v57 = vpack.c.bf16 %v1288_v56, %v1288_v56  ;;  %v492_v56 = vpack.c.bf16 %v476_v24, %v476_v24  ;;  %v1254_v49 = vunpack.c.l.bf16 %v1110_v45  ;;  %v1029_v12 = vperm.slane %v3632_v60, %v3435_v55  ;;  %v3051_v60 = vld [vmem:[%s3320_s14 + $0x28] sm:$0xf] }
 0x116   : > { %v1296_v17 = vpack.c.bf16 %v1280_v48, %v1280_v48  ;;  %v1294_v52 = vpack.c.bf16 %v1278_v38, %v1278_v38  ;;  %v1224_v4 = vpop.permute.xlu2 %1223  ;;  %v2785_v38 = vor.u32 %v2913_v51, %v2784_v40  ;;  %v490_v22 = vpack.c.bf16 %v474_v54, %v474_v54 }
 0x117   : > { %1320 = vst [vmem:[#allocation2 + $0xa8] sm:$0xf] %v1304_v57  ;;  %1923 = vperm.xlu0 %3012, %v3048_v35   ;;  %v1160_v1 = vpop.permute.xlu0 %1159  ;;  %v1229_v31 = vperm.slane %v1224_v4, %v3435_v55  ;;  %v1144_v28 = vpop.permute.xlu1 %1143  ;;  %v1095_v4 = vsub.f32 %v1063_v15, %v1079_v63  ;;  %v477_v39 = vcvt.s32.f32 %v461_v11  ;;  %v1113_v35 = vpack.c.bf16 %v1097_v43, %v1097_v43 }
 0x118   : > { %1312 = vst [vmem:[#allocation2 + $0x28] sm:$0xf] %v1296_v17  ;;  %v1165_v30 = vperm.slane %v1160_v1, %v3435_v55  ;;  %v1149_v27 = vperm.slane %v1144_v28, %v3435_v55  ;;  %v1381_v17 = vcvt.s32.f32 %v1365_v41  ;;  %v1084_v1 = vunpack.c.l.bf16 %v1045_v42 }
 0x119   : > { %1310 = vst [vmem:[#allocation2 + $0x8] sm:$0xf] %v1294_v52  ;;  %v1275_v9 = vunpack.c.l.bf16 %v1229_v31  ;;  %v1252_v52 = vunpack.c.l.bf16 %v1108_v44  ;;  %v1066_v46 = vunpack.c.l.bf16 %v490_v22  ;;  %v1082_v18 = vunpack.c.l.bf16 %v1029_v12 }
 0x11a   : > { %v1267_v7 = vunpack.c.l.bf16 %v1165_v30  ;;  %v1265_v5 = vunpack.c.l.bf16 %v1149_v27  ;;  %3019 = vset.pattern.permute.xlu2 %v3154_v23  ;;  %3018 = vset.pattern.permute.xlu1 %v3154_v23  ;;  %v3052_v30 = vld [vmem:[%s3253_s11 + $0x2c] sm:$0xf]  ;;  %v1397_v27 = vpack.c.bf16 %v1381_v17, %v1381_v17  ;;  %v1331_v21 = vunpack.c.1.s8 %v3687_v3 }
 0x11b   : > { %v1291_v8 = vmul.f32 %v1275_v9, %v1259_v20  ;;  %2507 = vmatpush.bf16.xpose.msra.mxu0 %v2801_v32  ;;  %1755 = vperm.xlu2 %3019, %v3049_v62   ;;  %v2768_v32 = vld [vmem:[#allocation2] sm:$0xf]  ;;  %v1111_v20 = vpack.c.bf16 %v1095_v4, %v1095_v4  ;;  %v493_v13 = vpack.c.bf16 %v477_v39, %v477_v39 }
 0x11c   : > { %v1283_v58 = vmul.f32 %v1267_v7, %v1251_v25  ;;  %v1281_v29 = vmul.f32 %v1265_v5, %v1249_v37  ;;  %1747 = vperm.xlu1 %3018, %v3046_v16   ;;  %v1068_v25 = vunpack.c.l.bf16 %v492_v56  ;;  %v3053_v7 = vld [vmem:[%s3253_s11 + $0x18] sm:$0xf]  ;;  %v2769_v24 = vor.u32 %v2909_v53, %v2768_v32 }
 0x11d   : > { %v1307_v6 = vpack.c.bf16 %v1291_v8, %v1291_v8  ;;  %v1257_v8 = vunpack.c.l.bf16 %v1113_v35  ;;  %v1589_v51 = vunpack.c.l.bf16 %v1397_v27  ;;  %v1347_v45 = vshra.s32 %v1331_v21, 4  ;;  %v3056_v27 = vld [vmem:[%s3253_s11 + $0x24] sm:$0xf] }
 0x11e   : > { %v1299_v33 = vpack.c.bf16 %v1283_v58, %v1283_v58  ;;  %v1297_v50 = vpack.c.bf16 %v1281_v29, %v1281_v29  ;;  %v1100_v62 = vsub.f32 %v1068_v25, %v1084_v1  ;;  %v1098_v29 = vsub.f32 %v1066_v46, %v1082_v18  ;;  %v3055_v18 = vld [vmem:[%s3320_s14 + $0x20] sm:$0xf] }
 0x11f   : > { %1323 = vst [vmem:[#allocation2 + $0xd8] sm:$0xf] %v1307_v6  ;;  %2123 = vperm.xlu0 %3012, %v3716_v47   ;;  %v1184_v16 = vpop.permute.xlu0 %1183  ;;  %v1168_v48 = vpop.permute.xlu1 %1167  ;;  %v1255_v54 = vunpack.c.l.bf16 %v1111_v20  ;;  %v1053_v6 = vperm.slane %v3653_v2, %v3435_v55  ;;  %v3057_v20 = vld [vmem:[%s3253_s11 + $0x10] sm:$0xf] }
 0x120   : > { %1315 = vst [vmem:[#allocation2 + $0x58] sm:$0xf] %v1299_v33  ;;  %v1189_v61 = vperm.slane %v1184_v16, %v3435_v55  ;;  %v1173_v57 = vperm.slane %v1168_v48, %v3435_v55  ;;  %v3723_v37 = vpop.permute.xlu2 %1459  ;;  %v1069_v33 = vunpack.c.l.bf16 %v493_v13  ;;  %v1116_v11 = vpack.c.bf16 %v1100_v62, %v1100_v62 }
 0x121   : > { %1313 = vst [vmem:[#allocation2 + $0x38] sm:$0xf] %v1297_v50  ;;  %v1114_v16 = vpack.c.bf16 %v1098_v29, %v1098_v29  ;;  %v1085_v2 = vunpack.c.l.bf16 %v1053_v6 }
 0x122   : > { %v1270_v34 = vunpack.c.l.bf16 %v1189_v61  ;;  %v1268_v14 = vunpack.c.l.bf16 %v1173_v57  ;;  %v1332_v61 = vunpack.c.2.s8 %v3687_v3  ;;  %v3747_v57 = vld [vmem:[%s3320_s14 + $0x1c] sm:$0xf] }
 0x123   : > { %2508 = vmatpush.bf16.xpose.msra.mxu0 %v2785_v38  ;;  %3021 = vset.pattern.permute.xlu2 %v3155_v19  ;;  %v1363_v38 = vand.u32 15, %v1347_v45  ;;  %v1258_v4 = vunpack.c.l.bf16 %v1114_v16 }
 0x124   : > { %v1286_v31 = vmul.f32 %v1270_v34, %v1254_v49  ;;  %v1284_v28 = vmul.f32 %v1268_v14, %v1252_v52  ;;  %3020 = vset.pattern.permute.xlu1 %v3155_v19  ;;  %2131 = vperm.xlu2 %3021, %v3051_v60   ;;  %v1101_v14 = vsub.f32 %v1069_v33, %v1085_v2  ;;  %v1348_v35 = vshra.s32 %v1332_v61, 4 }
 0x125   : > { %1947 = vperm.xlu1 %3020, %v3052_v30   ;;  %v1379_v34 = vcvt.s32.f32 %v1363_v38  ;;  %v1330_v2 = vunpack.c.0.s8 %v3687_v3 }
 0x126   : > { %v1302_v9 = vpack.c.bf16 %v1286_v31, %v1286_v31  ;;  %v1300_v59 = vpack.c.bf16 %v1284_v28, %v1284_v28  ;;  %v1364_v30 = vand.u32 15, %v1348_v35 }
 0x127   : > { %1907 = vperm.xlu0 %3012, %v3053_v7   ;;  %v1208_v5 = vpop.permute.xlu0 %1207  ;;  %v1192_v0 = vpop.permute.xlu1 %1191  ;;  %v1395_v28 = vpack.c.bf16 %v1379_v34, %v1379_v34  ;;  %v3800_v34 = vld [vmem:[%s3320_s14 + $0xc] sm:$0xf] }
 0x128   : > { %1318 = vst [vmem:[#allocation2 + $0x88] sm:$0xf] %v1302_v9  ;;  %v1213_v10 = vperm.slane %v1208_v5, %v3435_v55  ;;  %v1197_v15 = vperm.slane %v1192_v0, %v3435_v55  ;;  %v1484_v58 = vpop.permute.xlu2 %1483 }
 0x129   : > { %1316 = vst [vmem:[#allocation2 + $0x68] sm:$0xf] %v1300_v59  ;;  %v1489_v40 = vperm.slane %v1484_v58, %v3435_v55  ;;  %v1587_v5 = vunpack.c.l.bf16 %v1395_v28 }
 0x12a   : > { %v1273_v41 = vunpack.c.l.bf16 %v1213_v10  ;;  %v1271_v44 = vunpack.c.l.bf16 %v1197_v15 }
 0x12b   : > { %v1605_v63 = vunpack.c.l.bf16 %v1489_v40  ;;  %2509 = vmatpush.bf16.xpose.msra.mxu0 %v2769_v24  ;;  %v3771_v40 = vld [vmem:[%s3320_s14 + $0x14] sm:$0xf] }
 0x12c   : > { %v1289_v50 = vmul.f32 %v1273_v41, %v1257_v8  ;;  %v1287_v56 = vmul.f32 %v1271_v44, %v1255_v54  ;;  %3023 = vset.pattern.permute.xlu2 %v3154_v23  ;;  %v1380_v8 = vcvt.s32.f32 %v1364_v30 }
 0x12d   : > { %v3741_v48 = vsub.f32 %v1589_v51, %v1605_v63  ;;  %3022 = vset.pattern.permute.xlu1 %v3154_v23  ;;  %1739 = vperm.xlu2 %3023, %v3672_v26   ;;  %v1260_v26 = vunpack.c.l.bf16 %v1116_v11  ;;  %v3780_v63 = vld [vmem:[%s3403_s25 + $0x38] sm:$0xff]  ;;  %v3059_v11 = vld [vmem:[%s3253_s11 + $0x8] sm:$0xf] }
 0x12e   : > { %v1305_v43 = vpack.c.bf16 %v1289_v50, %v1289_v50  ;;  %v1303_v42 = vpack.c.bf16 %v1287_v56, %v1287_v56  ;;  %1731 = vperm.xlu1 %3022, %v3051_v60   ;;  %v1117_v60 = vpack.c.bf16 %v1101_v14, %v1101_v14  ;;  %v1396_v29 = vpack.c.bf16 %v1380_v8, %v1380_v8 }
 0x12f   : > { %2107 = vperm.xlu0 %3012, %v3747_v57   ;;  %v1232_v49 = vpop.permute.xlu0 %1231  ;;  %v1216_v22 = vpop.permute.xlu1 %1215  ;;  %v1343_v30 = vunpack.c.1.s8 %v3780_v63 }
 0x130   : > { %1321 = vst [vmem:[#allocation2 + $0xb8] sm:$0xf] %v1305_v43  ;;  %v1237_v12 = vperm.slane %v1232_v49, %v3435_v55  ;;  %v1221_v17 = vperm.slane %v1216_v22, %v3435_v55  ;;  %v3752_v52 = vpop.permute.xlu2 %1499  ;;  %v1261_v0 = vunpack.c.l.bf16 %v1117_v60  ;;  %v1588_v41 = vunpack.c.l.bf16 %v1396_v29  ;;  %v3060_v43 = vld [vmem:[%s3320_s14 + $0x18] sm:$0xf]  ;;  %v3064_v29 = vld [vmem:[%s3320_s14 + $0x10] sm:$0xf] }
 0x131   : > { %1319 = vst [vmem:[#allocation2 + $0x98] sm:$0xf] %v1303_v42  ;;  %v3061_v42 = vld [vmem:[%s3253_s11 + $0x1c] sm:$0xf] }
 0x132   : > { %v1276_v25 = vunpack.c.l.bf16 %v1237_v12  ;;  %v1274_v39 = vunpack.c.l.bf16 %v1221_v17  ;;  %v1346_v17 = vshra.s32 %v1330_v2, 4 }
 0x134   : > { %v1292_v1 = vmul.f32 %v1276_v25, %v1260_v26  ;;  %v1290_v31 = vmul.f32 %v1274_v39, %v1258_v4  ;;  %v2934_v25 = vld [vmem:[#allocation2 + $0xd4] sm:$0xf0]  ;;  %v1362_v39 = vand.u32 15, %v1346_v17 }
 0x135   : > { %3025 = vset.pattern.permute.xlu2 %v3155_v19 }
 0x136   : > { %v1308_v32 = vpack.c.bf16 %v1292_v1, %v1292_v1  ;;  %v1306_v46 = vpack.c.bf16 %v1290_v31, %v1290_v31  ;;  %3024 = vset.pattern.permute.xlu1 %v3155_v19  ;;  %2115 = vperm.xlu2 %3025, %v3055_v18   ;;  %v1378_v60 = vcvt.s32.f32 %v1362_v39  ;;  %v3834_v39 = vld [vmem:[%s3403_s25 + $0x28] sm:$0xff] }
 0x137   : > { %1931 = vperm.xlu1 %3024, %v3056_v27   ;;  %1891 = vperm.xlu0 %3012, %v3057_v20   ;;  %v1240_v9 = vpop.permute.xlu1 %1239  ;;  %v1344_v27 = vunpack.c.2.s8 %v3780_v63  ;;  %v3063_v20 = vld [vmem:[%s3253_s11] sm:$0xf] }
 0x138   : > { %1324 = vst [vmem:[#allocation2 + $0xe8] sm:$0xf] %v1308_v32  ;;  %v1245_v59 = vperm.slane %v1240_v9, %v3435_v55  ;;  %v3762_v53 = vpop.permute.xlu2 %1523  ;;  %v1468_v13 = vpop.permute.xlu0 %1467 }
 0x139   : > { %1322 = vst [vmem:[#allocation2 + $0xc8] sm:$0xf] %v1306_v46  ;;  %v1473_v7 = vperm.slane %v1468_v13, %v3435_v55 }
 0x13a   : > { %v1277_v24 = vunpack.c.l.bf16 %v1245_v59  ;;  %v1394_v59 = vpack.c.bf16 %v1378_v60, %v1378_v60 }
 0x13b   : > { %v1603_v62 = vunpack.c.l.bf16 %v1473_v7 }
 0x13c   : > { %v1293_v10 = vmul.f32 %v1277_v24, %v1261_v0  ;;  %v2856_v0 = vld [vmem:[#allocation2 + $0xa8] sm:$0xf]  ;;  %v1424_v24 = vand.u32 15, %v1344_v27 }
 0x13d   : > { %v3765_v15 = vsub.f32 %v1587_v5, %v1603_v62 }
 0x13e   : > { %v1309_v58 = vpack.c.bf16 %v1293_v10, %v1293_v10  ;;  %3027 = vset.pattern.permute.xlu2 %v3154_v23 }
 0x13f   : > { %3026 = vset.pattern.permute.xlu1 %v3154_v23  ;;  %1723 = vperm.xlu2 %3027, %v3716_v47   ;;  %v1345_v47 = vunpack.c.3.s8 %v3780_v63  ;;  %v2888_v50 = vld [vmem:[#allocation2 + $0xe8] sm:$0xf] }
 0x140   : > { %1325 = vst [vmem:[#allocation2 + $0xf8] sm:$0xf] %v1309_v58  ;;  %1715 = vperm.xlu1 %3026, %v3055_v18   ;;  %2091 = vperm.xlu0 %3012, %v3771_v40   ;;  %v3774_v51 = vpop.permute.xlu2 %1547  ;;  %v3776_v45 = vpop.permute.xlu0 %1507  ;;  %v2872_v4 = vld [vmem:[#allocation2 + $0xc8] sm:$0xf]  ;;  %v2930_v18 = vld [vmem:[#allocation2 + $0xb4] sm:$0xf0] }
 0x141   : > { %v1476_v54 = vpop.permute.xlu1 %1475  ;;  %v1361_v22 = vshra.s32 %v1345_v47, 4  ;;  %v2873_v1 = vor.u32 %v2934_v25, %v2872_v4  ;;  %v1425_v46 = vand.u32 15, %v1345_v47  ;;  %v2857_v8 = vor.u32 %v2930_v18, %v2856_v0 }
 0x142   : > { %v1481_v6 = vperm.slane %v1476_v54, %v3435_v55  ;;  %v3065_v54 = vld [vmem:[%s3253_s11 + $0x14] sm:$0xf] }
 0x143   : > { %v1377_v26 = vand.u32 15, %v1361_v22  ;;  %v1441_v10 = vcvt.s32.f32 %v1425_v46  ;;  %v2926_v22 = vld [vmem:[#allocation2 + $0x94] sm:$0xf0] }
 0x144   : > { %v1604_v44 = vunpack.c.l.bf16 %v1481_v6  ;;  %v1586_v6 = vunpack.c.l.bf16 %v1394_v59 }
 0x145   : > { %v1393_v31 = vcvt.s32.f32 %v1377_v26  ;;  %v1360_v26 = vshra.s32 %v1344_v27, 4 }
 0x146   : > { %v3783_v33 = vsub.f32 %v1588_v41, %v1604_v44  ;;  %v1342_v44 = vunpack.c.0.s8 %v3780_v63 }
 0x147   : > { %3029 = vset.pattern.permute.xlu2 %v3155_v19  ;;  %v2938_v56 = vld [vmem:[#allocation2 + $0xf4] sm:$0xf0]  ;;  %v1409_v32 = vpack.c.bf16 %v1393_v31, %v1393_v31 }
 0x148   : > { %3028 = vset.pattern.permute.xlu1 %v3155_v19  ;;  %1875 = vperm.xlu0 %3012, %v3059_v11   ;;  %v3788_v16 = vpop.permute.xlu0 %1531  ;;  %v2889_v38 = vor.u32 %v2938_v56, %v2888_v50  ;;  %v3795_v12 = vpop.permute.xlu2 %1571  ;;  %v1440_v50 = vcvt.s32.f32 %v1424_v24  ;;  %v1457_v56 = vpack.c.bf16 %v1441_v10, %v1441_v10  ;;  %v1376_v24 = vand.u32 15, %v1360_v26 }
 0x149   : > { %2099 = vperm.xlu2 %3029, %v3060_v43   ;;  %1915 = vperm.xlu1 %3028, %v3061_v42   ;;  %v3793_v49 = vpop.permute.xlu1 %1491  ;;  %v1601_v5 = vunpack.c.l.bf16 %v1409_v32  ;;  %v3830_v42 = vld [vmem:[%s3320_s14 + $0x4] sm:$0xf]  ;;  %v2840_v32 = vld [vmem:[#allocation2 + $0x88] sm:$0xf] }
 0x14a   : > { %2540 = vmatpush.bf16.xpose.msra.mxu2 %v2889_v38  ;;  %v1422_v38 = vand.u32 15, %v1342_v44  ;;  %v2001_v60 = vunpack.c.l.bf16 %v1457_v56 }
 0x14c   : > { %v1438_v27 = vcvt.s32.f32 %v1422_v38 }
 0x150   : > { %2075 = vperm.xlu0 %3012, %v3800_v34   ;;  %v3803_v14 = vpop.permute.xlu0 %1555 }
 0x151   : > { %3031 = vset.pattern.permute.xlu2 %v3154_v23  ;;  %3030 = vset.pattern.permute.xlu1 %v3154_v23  ;;  %v3807_v35 = vpop.permute.xlu1 %1515 }
 0x152   : > { %1707 = vperm.xlu2 %3031, %v3747_v57   ;;  %1699 = vperm.xlu1 %3030, %v3060_v43   ;;  %v3810_v28 = vpop.permute.xlu2 %1971  ;;  %v1465_v57 = vperm.slane %v3723_v37, %v3435_v55  ;;  %v1359_v37 = vshra.s32 %v1343_v30, 4 }
 0x153   : > { %2541 = vmatpush.bf16.xpose.msra.mxu2 %v2873_v1  ;;  %v1456_v1 = vpack.c.bf16 %v1440_v50, %v1440_v50  ;;  %v1977_v46 = vperm.slane %v3810_v28, %v3435_v55  ;;  %v1341_v28 = vunpack.c.3.s8 %v3834_v39 }
 0x154   : > { %v1602_v41 = vunpack.c.l.bf16 %v1465_v57  ;;  %v1375_v11 = vand.u32 15, %v1359_v37 }
 0x155   : > { %v1357_v56 = vshra.s32 %v1341_v28, 4 }
 0x156   : > { %v1618_v17 = vsub.f32 %v1586_v6, %v1602_v41  ;;  %v1391_v18 = vcvt.s32.f32 %v1375_v11  ;;  %v1454_v6 = vpack.c.bf16 %v1438_v27, %v1438_v27  ;;  %v1392_v11 = vcvt.s32.f32 %v1376_v24 }
 0x158   : > { %1859 = vperm.xlu0 %3012, %v3063_v20   ;;  %v1580_v9 = vpop.permute.xlu0 %1579  ;;  %v2841_v20 = vor.u32 %v2926_v22, %v2840_v32  ;;  %v1634_v0 = vpack.c.bf16 %v1618_v17, %v1618_v17  ;;  %v1407_v37 = vpack.c.bf16 %v1391_v18, %v1391_v18  ;;  %v1340_v22 = vunpack.c.2.s8 %v3834_v39 }
 0x159   : > { %v3817_v13 = vpop.permute.xlu1 %1539  ;;  %v1585_v7 = vperm.slane %v1580_v9, %v3435_v55 }
 0x15a   : > { %3033 = vset.pattern.permute.xlu2 %v3155_v19  ;;  %3032 = vset.pattern.permute.xlu1 %v3155_v19  ;;  %v2172_v62 = vpop.permute.xlu2 %2171 }
 0x15b   : > { %v1617_v58 = vunpack.c.l.bf16 %v1585_v7  ;;  %2083 = vperm.xlu2 %3033, %v3064_v29   ;;  %1899 = vperm.xlu1 %3032, %v3065_v54   ;;  %v2177_v57 = vperm.slane %v2172_v62, %v3435_v55  ;;  %v2016_v54 = vunpack.c.l.bf16 %v1977_v46  ;;  %v1599_v46 = vunpack.c.l.bf16 %v1407_v37 }
 0x15c   : > { %2542 = vmatpush.bf16.xpose.msra.mxu2 %v2857_v8 }
 0x15d   : > { %v1633_v47 = vsub.f32 %v1601_v5, %v1617_v58  ;;  %v2000_v58 = vunpack.c.l.bf16 %v1456_v1  ;;  %v2209_v41 = vunpack.c.l.bf16 %v2177_v57  ;;  %v2922_v1 = vld [vmem:[#allocation2 + $0x74] sm:$0xf0] }
 0x15f   : > { %v1649_v43 = vpack.c.bf16 %v1633_v47, %v1633_v47 }
 0x160   : > { %2059 = vperm.xlu0 %3012, %v3830_v42  }
 0x161   : > { %v1564_v4 = vpop.permute.xlu1 %1563  ;;  %v1980_v25 = vpop.permute.xlu0 %1979  ;;  %v1793_v59 = vunpack.c.l.bf16 %v1649_v43 }
 0x162   : > { %v1985_v31 = vperm.slane %v1980_v25, %v3435_v55  ;;  %v1569_v62 = vperm.slane %v1564_v4, %v3435_v55 }
 0x163   : > { %3035 = vset.pattern.permute.xlu2 %v3154_v23  ;;  %3034 = vset.pattern.permute.xlu1 %v3154_v23  ;;  %v1772_v9 = vpop.permute.xlu2 %1771 }
 0x164   : > { %v2017_v7 = vunpack.c.l.bf16 %v1985_v31  ;;  %1691 = vperm.xlu2 %3035, %v3771_v40   ;;  %1683 = vperm.xlu1 %3034, %v3064_v29   ;;  %v1777_v5 = vperm.slane %v1772_v9, %v3435_v55  ;;  %v2824_v40 = vld [vmem:[#allocation2 + $0x68] sm:$0xf]  ;;  %v1778_v29 = vunpack.c.l.bf16 %v1634_v0  ;;  %v2032_v31 = vsub.f32 %v2000_v58, %v2016_v54 }
 0x165   : > { %2543 = vmatpush.bf16.xpose.msra.mxu2 %v2841_v20  ;;  %v2825_v32 = vor.u32 %v2922_v1, %v2824_v40  ;;  %v1615_v18 = vunpack.c.l.bf16 %v1569_v62  ;;  %v1577_v0 = vperm.slane %v3795_v12, %v3435_v55  ;;  %v1420_v58 = vand.u32 15, %v1340_v22 }
 0x166   : > { %v2033_v8 = vsub.f32 %v2001_v60, %v2017_v7  ;;  %v1809_v10 = vunpack.c.l.bf16 %v1777_v5  ;;  %v1998_v60 = vunpack.c.l.bf16 %v1454_v6  ;;  %v3067_v7 = vld [vmem:[%s3320_s14 + $0x8] sm:$0xf]  ;;  %v2048_v54 = vpack.c.bf16 %v2032_v31, %v2032_v31 }
 0x167   : > { %v1373_v6 = vand.u32 15, %v1357_v56  ;;  %v1616_v12 = vunpack.c.l.bf16 %v1577_v0 }
 0x168   : > { %v2049_v47 = vpack.c.bf16 %v2033_v8, %v2033_v8  ;;  %v1825_v50 = vmul.f32 %v1809_v10, %v1793_v59  ;;  %v1408_v59 = vpack.c.bf16 %v1392_v11, %v1392_v11  ;;  %v3068_v10 = vld [vmem:[%s3253_s11 + $0xc] sm:$0xf] }
 0x169   : > { %v1652_v38 = vpop.permute.xlu1 %1651  ;;  %v1956_v43 = vpop.permute.xlu0 %1955  ;;  %v1389_v56 = vcvt.s32.f32 %v1373_v6 }
 0x16a   : > { %v2193_v17 = vunpack.c.l.bf16 %v2049_v47  ;;  %v1841_v26 = vpack.c.bf16 %v1825_v50, %v1825_v50  ;;  %v1657_v25 = vperm.slane %v1652_v38, %v3435_v55  ;;  %v1961_v4 = vperm.slane %v1956_v43, %v3435_v55  ;;  %v2918_v47 = vld [vmem:[#allocation2 + $0x54] sm:$0xf0]  ;;  %v2808_v43 = vld [vmem:[#allocation2 + $0x48] sm:$0xf] }
 0x16b   : > { %v1600_v38 = vunpack.c.l.bf16 %v1408_v59  ;;  %v2809_v31 = vor.u32 %v2918_v47, %v2808_v43  ;;  %v1339_v47 = vunpack.c.1.s8 %v3834_v39 }
 0x16c   : > { %v2225_v20 = vmul.f32 %v2209_v41, %v2193_v17  ;;  %1857 = vst [vmem:[#allocation2 + $0xf4] sm:$0xf] %v1841_v26  ;;  %v1794_v9 = vunpack.c.l.bf16 %v1657_v25  ;;  %3037 = vset.pattern.permute.xlu2 %v3155_v19  ;;  %3036 = vset.pattern.permute.xlu1 %v3155_v19  ;;  %v2148_v27 = vpop.permute.xlu2 %2147  ;;  %v2014_v57 = vunpack.c.l.bf16 %v1961_v4  ;;  %v1631_v41 = vsub.f32 %v1599_v46, %v1615_v18 }
 0x16d   : > { %2544 = vmatpush.bf16.xpose.msra.mxu2 %v2825_v32  ;;  %2067 = vperm.xlu2 %3037, %v3067_v7   ;;  %v2153_v5 = vperm.slane %v2148_v27, %v3435_v55  ;;  %v1436_v17 = vcvt.s32.f32 %v1420_v58  ;;  %v2192_v26 = vunpack.c.l.bf16 %v2048_v54 }
 0x16e   : > { %v2241_v24 = vpack.c.bf16 %v2225_v20, %v2225_v20  ;;  %v1810_v8 = vmul.f32 %v1794_v9, %v1778_v29  ;;  %1883 = vperm.xlu1 %3036, %v3068_v10   ;;  %v2030_v37 = vsub.f32 %v1998_v60, %v2014_v57  ;;  %v1647_v4 = vpack.c.bf16 %v1631_v41, %v1631_v41 }
 0x16f   : > { %v2206_v40 = vunpack.c.l.bf16 %v2153_v5  ;;  %v1358_v60 = vshra.s32 %v1342_v44, 4  ;;  %v1632_v20 = vsub.f32 %v1600_v38, %v1616_v12  ;;  %v1452_v27 = vpack.c.bf16 %v1436_v17, %v1436_v17 }
 0x170   : > { %2257 = vst [vmem:[#allocation2 + $0xfc] sm:$0xf] %v2241_v24  ;;  %v1826_v62 = vpack.c.bf16 %v1810_v8, %v1810_v8  ;;  %v2046_v50 = vpack.c.bf16 %v2030_v37, %v2030_v37  ;;  %v1405_v5 = vpack.c.bf16 %v1389_v56, %v1389_v56  ;;  %v1791_v0 = vunpack.c.l.bf16 %v1647_v4  ;;  %v2914_v24 = vld [vmem:[#allocation2 + $0x34] sm:$0xf0] }
 0x171   : > { %v3860_v11 = vpop.permute.xlu0 %2155  ;;  %v1553_v8 = vperm.slane %v3774_v51, %v3435_v55  ;;  %v1374_v10 = vand.u32 15, %v1358_v60  ;;  %v1648_v37 = vpack.c.bf16 %v1632_v20, %v1632_v20  ;;  %v1338_v51 = vunpack.c.0.s8 %v3834_v39  ;;  %v3069_v60 = vld [vmem:[%s3320_s14] sm:$0xf]  ;;  %v3070_v20 = vld [vmem:[%s3253_s11 + $0x4] sm:$0xf]  ;;  %s3085_s11 = sshra.s32 %s2600_s10, 4  ;;  %s3086_s11 = int_to_ptr.hbm [resolvable:$true] %s3085_s11 }
 0x172   : > { %1842 = vst [vmem:[#allocation2 + $0x4] sm:$0xf] %v1826_v62  ;;  %v2164_v29 = vpop.permute.xlu1 %2163  ;;  %v2190_v25 = vunpack.c.l.bf16 %v2046_v50  ;;  %v1996_v62 = vunpack.c.l.bf16 %v1452_v27  ;;  %v1597_v63 = vunpack.c.l.bf16 %v1405_v5  ;;  %v1355_v4 = vshra.s32 %v1339_v47, 4  ;;  %s3087_s12 = scalar_lea.hbm %s3086_s11, 32  ;;  %p3092_p3 = scmp.lt.s32.totalorder %s3086_s11, %s4115_s5 }
 0x173   : > { %v2169_v1 = vperm.slane %v2164_v29, %v3435_v55  ;;  %v1390_v43 = vcvt.s32.f32 %v1374_v10  ;;  %v1418_v56 = vand.u32 15, %v1338_v51  ;;  %v2910_v10 = vld [vmem:[#allocation2 + $0x14] sm:$0xf0]  ;;  %p3088_p0 = scmp.ne.s32.totalorder %s3086_s11, %s3087_s12  ;;  %p3093_p5 = scmp.lt.s32.totalorder %s3091_s15, %s3087_s12 }
 0x174   : > { %v2222_v32 = vmul.f32 %v2206_v40, %v2190_v25 }
 0x175   : > { %v2208_v46 = vunpack.c.l.bf16 %v2169_v1  ;;  %2545 = vmatpush.bf16.xpose.msra.mxu2 %v2809_v31  ;;  %3039 = vset.pattern.permute.xlu2 %v3154_v23  ;;  %v1756_v18 = vpop.permute.xlu2 %1755  ;;  %p3089_p1 = pnand %p3088_p0, %p3229_p4  ;;  %p3094_p6 = por %p3093_p5, %p3092_p3 }
 0x176   : > { %3038 = vset.pattern.permute.xlu1 %v3154_v23  ;;  %1675 = vperm.xlu2 %3039, %v3800_v34   ;;  %v1761_v9 = vperm.slane %v1756_v18, %v3435_v55  ;;  %v2238_v59 = vpack.c.bf16 %v2222_v32, %v2222_v32  ;;  %v1423_v34 = vand.u32 15, %v1343_v30  ;;  %v1613_v30 = vunpack.c.l.bf16 %v1553_v8 }
 0x177   : > { %v2224_v57 = vmul.f32 %v2208_v46, %v2192_v26  ;;  %1667 = vperm.xlu1 %3038, %v3067_v7   ;;  %v2792_v7 = vld [vmem:[#allocation2 + $0x28] sm:$0xf]  ;;  %v1792_v26 = vunpack.c.l.bf16 %v1648_v37  ;;  %v2890_v27 = vld [vmem:[#allocation2 + $0xf8] sm:$0xf0]  ;;  %p3090_p2 = pneg %p3089_p1 }
 0x178   : > { %v1807_v44 = vunpack.c.l.bf16 %v1761_v9  ;;  %2254 = vst [vmem:[#allocation2 + $0xcc] sm:$0xf] %v2238_v59  ;;  %v2793_v40 = vor.u32 %v2914_v24, %v2792_v7  ;;  %v1439_v17 = vcvt.s32.f32 %v1423_v34  ;;  %v2776_v9 = vld [vmem:[#allocation2 + $0x8] sm:$0xf]  ;;  %v1406_v59 = vpack.c.bf16 %v1390_v43, %v1390_v43 }
 0x179   : > { %v2240_v58 = vpack.c.bf16 %v2224_v57, %v2224_v57  ;;  %v1940_v54 = vpop.permute.xlu0 %1939  ;;  %v1561_v57 = vperm.slane %v3803_v14, %v3435_v55  ;;  %v1629_v24 = vsub.f32 %v1597_v63, %v1613_v30  ;;  %v1371_v34 = vand.u32 15, %v1355_v4  ;;  %v3899_v4 = vld [vmem:[%s3403_s25 + $0x18] sm:$0xff]  ;;  %s4065_s25 = scalar_lea.vmem [#allocation3], %s2726_s24  ;;  %p3095_p7 = pnand %p3094_p6, %p3090_p2 }
 0x17a   : > { %v1823_v6 = vmul.f32 %v1807_v44, %v1791_v0  ;;  %v1945_v41 = vperm.slane %v1940_v54, %v3435_v55  ;;  %v1455_v44 = vpack.c.bf16 %v1439_v17, %v1439_v17  ;;  %v1434_v54 = vcvt.s32.f32 %v1418_v56  ;;  %s2597_s9 = sshll.u32 %s4065_s25, 4  ;;  %s2598_s9 = int_to_ptr.vmem [resolvable:$true] %s2597_s9 }
 0x17b   : > { %2256 = vst [vmem:[#allocation2 + $0xec] sm:$0xf] %v2240_v58  ;;  %v1764_v50 = vpop.permute.xlu1 %1763  ;;  %v2777_v37 = vor.u32 %v2910_v10, %v2776_v9  ;;  %v1598_v14 = vunpack.c.l.bf16 %v1406_v59  ;;  %v1387_v30 = vcvt.s32.f32 %v1371_v34  ;;  %v1537_v9 = vperm.slane %v3788_v16, %v3435_v55 }
 0x17c   : > { %v1839_v38 = vpack.c.bf16 %v1823_v6, %v1823_v6  ;;  %v2012_v12 = vunpack.c.l.bf16 %v1945_v41  ;;  %v1769_v29 = vperm.slane %v1764_v50, %v3435_v55  ;;  %v1356_v41 = vshra.s32 %v1340_v22, 4 }
 0x17d   : > { %2546 = vmatpush.bf16.xpose.msra.mxu2 %v2793_v40  ;;  %v1614_v50 = vunpack.c.l.bf16 %v1561_v57  ;;  %v1450_v63 = vpack.c.bf16 %v1434_v54, %v1434_v54 }
 0x17e   : > { %1855 = vst [vmem:[#allocation2 + $0xd4] sm:$0xf] %v1839_v38  ;;  %v2028_v25 = vsub.f32 %v1996_v62, %v2012_v12  ;;  %v1808_v1 = vunpack.c.l.bf16 %v1769_v29  ;;  %3041 = vset.pattern.permute.xlu2 %v3155_v19  ;;  %v2132_v31 = vpop.permute.xlu2 %2131  ;;  %v1999_v38 = vunpack.c.l.bf16 %v1455_v44  ;;  %v1645_v12 = vpack.c.bf16 %v1629_v24, %v1629_v24 }
 0x17f   : > { %3040 = vset.pattern.permute.xlu1 %v3155_v19  ;;  %2051 = vperm.xlu2 %3041, %v3069_v60   ;;  %v2137_v32 = vperm.slane %v2132_v31, %v3435_v55  ;;  %v1421_v44 = vand.u32 15, %v1341_v28  ;;  %v1337_v24 = vunpack.c.3.s8 %v3899_v4 }
 0x180   : > { %v2044_v46 = vpack.c.bf16 %v2028_v25, %v2028_v25  ;;  %v1824_v18 = vmul.f32 %v1808_v1, %v1792_v26  ;;  %1867 = vperm.xlu1 %3040, %v3070_v20   ;;  %v1630_v26 = vsub.f32 %v1598_v14, %v1614_v50  ;;  %v1372_v25 = vand.u32 15, %v1356_v41 }
 0x181   : > { %v2204_v5 = vunpack.c.l.bf16 %v2137_v32  ;;  %v3888_v0 = vpop.permute.xlu0 %2139  ;;  %v2161_v1 = vperm.slane %v3860_v11, %v3435_v55  ;;  %v1789_v60 = vunpack.c.l.bf16 %v1645_v12  ;;  %v1403_v20 = vpack.c.bf16 %v1387_v30, %v1387_v30  ;;  %v2882_v11 = vld [vmem:[#allocation2 + $0xf0] sm:$0xf0] }
 0x182   : > { %v2188_v19 = vunpack.c.l.bf16 %v2044_v46  ;;  %v1840_v8 = vpack.c.bf16 %v1824_v18, %v1824_v18  ;;  %v2936_v58 = vld [vmem:[#allocation2 + $0xec] sm:$0xf]  ;;  %v1994_v18 = vunpack.c.l.bf16 %v1450_v63  ;;  %v1611_v41 = vunpack.c.l.bf16 %v1537_v9 }
 0x183   : > { %v2893_v6 = vor.u32 %v2936_v58, %v2890_v27  ;;  %v1388_v58 = vcvt.s32.f32 %v1372_v25  ;;  %v1437_v50 = vcvt.s32.f32 %v1421_v44  ;;  %v1353_v30 = vshra.s32 %v1337_v24, 4 }
 0x184   : > { %1856 = vst [vmem:[#allocation2 + $0xe4] sm:$0xf] %v1840_v8  ;;  %v2220_v62 = vmul.f32 %v2204_v5, %v2188_v19  ;;  %v1964_v7 = vpop.permute.xlu1 %1963  ;;  %v1646_v19 = vpack.c.bf16 %v1630_v26, %v1630_v26  ;;  %v2207_v8 = vunpack.c.l.bf16 %v2161_v1  ;;  %v1545_v25 = vperm.slane %v3817_v13, %v3435_v55 }
 0x185   : > { %2547 = vmatpush.bf16.xpose.msra.mxu2 %v2777_v37  ;;  %v1969_v40 = vperm.slane %v1964_v7, %v3435_v55  ;;  %2559 = vmatpush.bf16.xpose.msra.mxu3 %v2893_v6  ;;  %v1595_v6 = vunpack.c.l.bf16 %v1403_v20  ;;  %v1354_v13 = vshra.s32 %v1338_v51, 4 }
 0x186   : > { %v2236_v29 = vpack.c.bf16 %v2220_v62, %v2220_v62 }
 0x187   : > { %v2015_v43 = vunpack.c.l.bf16 %v1969_v40  ;;  %v1740_v17 = vpop.permute.xlu2 %1739  ;;  %v1790_v40 = vunpack.c.l.bf16 %v1646_v19  ;;  %v1627_v26 = vsub.f32 %v1595_v6, %v1611_v41 }
 0x188   : > { %2252 = vst [vmem:[#allocation2 + $0xac] sm:$0xf] %v2236_v29  ;;  %3042 = vset.pattern.permute.xlu1 %v3154_v23  ;;  %v1745_v22 = vperm.slane %v1740_v17, %v3435_v55  ;;  %v1336_v23 = vunpack.c.2.s8 %v3899_v4 }
 0x189   : > { %v2031_v31 = vsub.f32 %v1999_v38, %v2015_v43  ;;  %1659 = vperm.xlu1 %3042, %v3830_v42   ;;  %v1924_v56 = vpop.permute.xlu0 %1923  ;;  %v1404_v43 = vpack.c.bf16 %v1388_v58, %v1388_v58  ;;  %v1643_v20 = vpack.c.bf16 %v1627_v26, %v1627_v26 }
 0x18a   : > { %v1805_v32 = vunpack.c.l.bf16 %v1745_v22  ;;  %v1929_v46 = vperm.slane %v1924_v56, %v3435_v55  ;;  %v1416_v16 = vand.u32 15, %v1336_v23  ;;  %v1453_v56 = vpack.c.bf16 %v1437_v50, %v1437_v50 }
 0x18b   : > { %v2047_v27 = vpack.c.bf16 %v2031_v31, %v2031_v31  ;;  %v2935_v59 = vld [vmem:[#allocation2 + $0xe4] sm:$0xf]  ;;  %v1596_v9 = vunpack.c.l.bf16 %v1404_v43  ;;  %v1370_v50 = vand.u32 15, %v1354_v13  ;;  %v2866_v43 = vld [vmem:[#allocation2 + $0xd0] sm:$0xf0] }
 0x18c   : > { %v1821_v57 = vmul.f32 %v1805_v32, %v1789_v60  ;;  %v2010_v5 = vunpack.c.l.bf16 %v1929_v46  ;;  %v2885_v42 = vor.u32 %v2935_v59, %v2882_v11  ;;  %v1432_v22 = vcvt.s32.f32 %v1416_v16 }
 0x18d   : > { %v2191_v10 = vunpack.c.l.bf16 %v2047_v27  ;;  %v1369_v46 = vand.u32 15, %v1353_v30  ;;  %v1612_v27 = vunpack.c.l.bf16 %v1545_v25 }
 0x18e   : > { %v1837_v54 = vpack.c.bf16 %v1821_v57, %v1821_v57  ;;  %v2026_v34 = vsub.f32 %v1994_v18, %v2010_v5  ;;  %v1748_v37 = vpop.permute.xlu1 %1747  ;;  %2521 = vmatpush.bf16.xpose.msra.mxu1 %v2885_v42  ;;  %v1448_v18 = vpack.c.bf16 %v1432_v22, %v1432_v22  ;;  %v1997_v5 = vunpack.c.l.bf16 %v1453_v56  ;;  %v2932_v42 = vld [vmem:[#allocation2 + $0xcc] sm:$0xf] }
 0x18f   : > { %v2223_v62 = vmul.f32 %v2207_v8, %v2191_v10  ;;  %v1753_v7 = vperm.slane %v1748_v37, %v3435_v55  ;;  %v1787_v37 = vunpack.c.l.bf16 %v1643_v20  ;;  %v1385_v16 = vcvt.s32.f32 %v1369_v46 }
 0x190   : > { %1853 = vst [vmem:[#allocation2 + $0xb4] sm:$0xf] %v1837_v54  ;;  %v2042_v28 = vpack.c.bf16 %v2026_v34, %v2026_v34  ;;  %v2116_v14 = vpop.permute.xlu2 %2115  ;;  %v1992_v54 = vunpack.c.l.bf16 %v1448_v18  ;;  %v1628_v6 = vsub.f32 %v1596_v9, %v1612_v27  ;;  %v1386_v46 = vcvt.s32.f32 %v1370_v50 }
 0x191   : > { %v2239_v38 = vpack.c.bf16 %v2223_v62, %v2223_v62  ;;  %v1806_v12 = vunpack.c.l.bf16 %v1753_v7  ;;  %v2121_v29 = vperm.slane %v2116_v14, %v3435_v55  ;;  %v3912_v63 = vpop.permute.xlu0 %2123  ;;  %v2145_v62 = vperm.slane %v3888_v0, %v3435_v55 }
 0x192   : > { %v2186_v17 = vunpack.c.l.bf16 %v2042_v28  ;;  %v1335_v14 = vunpack.c.1.s8 %v3899_v4  ;;  %v1401_v22 = vpack.c.bf16 %v1385_v16, %v1385_v16  ;;  %v1521_v0 = vperm.slane %v3807_v35, %v3435_v55 }
 0x193   : > { %2255 = vst [vmem:[#allocation2 + $0xdc] sm:$0xf] %v2239_v38  ;;  %v1822_v1 = vmul.f32 %v1806_v12, %v1790_v40  ;;  %v2202_v31 = vunpack.c.l.bf16 %v2121_v29  ;;  %v1334_v40 = vunpack.c.0.s8 %v3899_v4  ;;  %v1644_v26 = vpack.c.bf16 %v1628_v6, %v1628_v6 }
 0x194   : > { %v1593_v9 = vunpack.c.l.bf16 %v1401_v22  ;;  %v1609_v27 = vunpack.c.l.bf16 %v1521_v0 }
 0x195   : > { %v1838_v60 = vpack.c.bf16 %v1822_v1, %v1822_v1  ;;  %v2218_v32 = vmul.f32 %v2202_v31, %v2186_v17  ;;  %v1419_v17 = vand.u32 15, %v1339_v47  ;;  %v2205_v1 = vunpack.c.l.bf16 %v2145_v62 }
 0x197   : > { %1854 = vst [vmem:[#allocation2 + $0xc4] sm:$0xf] %v1838_v60  ;;  %v2234_v59 = vpack.c.bf16 %v2218_v32, %v2218_v32  ;;  %v1948_v11 = vpop.permute.xlu1 %1947  ;;  %v1414_v32 = vand.u32 15, %v1334_v40  ;;  %v1435_v35 = vcvt.s32.f32 %v1419_v17 }
 0x198   : > { %v1953_v57 = vperm.slane %v1948_v11, %v3435_v55 }
 0x199   : > { %2250 = vst [vmem:[#allocation2 + $0x8c] sm:$0xf] %v2234_v59  ;;  %v1724_v44 = vpop.permute.xlu2 %1723  ;;  %v1908_v19 = vpop.permute.xlu0 %1907  ;;  %v1788_v59 = vunpack.c.l.bf16 %v1644_v26 }
 0x19a   : > { %v2013_v8 = vunpack.c.l.bf16 %v1953_v57  ;;  %v1729_v10 = vperm.slane %v1724_v44, %v3435_v55  ;;  %v1913_v58 = vperm.slane %v1908_v19, %v3435_v55  ;;  %v2874_v34 = vld [vmem:[#allocation2 + $0xd8] sm:$0xf0]  ;;  %v1430_v44 = vcvt.s32.f32 %v1414_v32 }
 0x19b   : > { %v2877_v41 = vor.u32 %v2932_v42, %v2874_v34  ;;  %v1402_v19 = vpack.c.bf16 %v1386_v46, %v1386_v46  ;;  %v1451_v34 = vpack.c.bf16 %v1435_v35, %v1435_v35  ;;  %v2129_v32 = vperm.slane %v3912_v63, %v3435_v55 }
 0x19c   : > { %v2029_v7 = vsub.f32 %v1997_v5, %v2013_v8  ;;  %v1803_v28 = vunpack.c.l.bf16 %v1729_v10  ;;  %v2008_v51 = vunpack.c.l.bf16 %v1913_v58  ;;  %v1351_v5 = vshra.s32 %v1335_v14, 4 }
 0x19d   : > { %2560 = vmatpush.bf16.xpose.msra.mxu3 %v2877_v41  ;;  %v1529_v8 = vperm.slane %v3762_v53, %v3435_v55  ;;  %v1446_v62 = vpack.c.bf16 %v1430_v44, %v1430_v44  ;;  %v2203_v44 = vunpack.c.l.bf16 %v2129_v32 }
 0x19e   : > { %v2045_v38 = vpack.c.bf16 %v2029_v7, %v2029_v7  ;;  %v1819_v12 = vmul.f32 %v1803_v28, %v1787_v37  ;;  %v2024_v29 = vsub.f32 %v1992_v54, %v2008_v51  ;;  %v2931_v30 = vld [vmem:[#allocation2 + $0xc4] sm:$0xf]  ;;  %v1625_v37 = vsub.f32 %v1593_v9, %v1609_v27 }
 0x19f   : > { %v2869_v25 = vor.u32 %v2931_v30, %v2866_v43  ;;  %v1367_v6 = vand.u32 15, %v1351_v5  ;;  %v1594_v7 = vunpack.c.l.bf16 %v1402_v19  ;;  %v1610_v28 = vunpack.c.l.bf16 %v1529_v8 }
 0x1a0   : > { %v2189_v31 = vunpack.c.l.bf16 %v2045_v38  ;;  %v1835_v56 = vpack.c.bf16 %v1819_v12, %v1819_v12  ;;  %v1732_v60 = vpop.permute.xlu1 %1731  ;;  %v2040_v47 = vpack.c.bf16 %v2024_v29, %v2024_v29  ;;  %v1995_v12 = vunpack.c.l.bf16 %v1451_v34 }
 0x1a1   : > { %v1737_v18 = vperm.slane %v1732_v60, %v3435_v55  ;;  %2522 = vmatpush.bf16.xpose.msra.mxu1 %v2869_v25  ;;  %v3934_v20 = vpop.permute.xlu0 %2107  ;;  %v1352_v30 = vshra.s32 %v1336_v23, 4  ;;  %v1641_v43 = vpack.c.bf16 %v1625_v37, %v1625_v37  ;;  %v1383_v17 = vcvt.s32.f32 %v1367_v6 }
 0x1a2   : > { %v2221_v39 = vmul.f32 %v2205_v1, %v2189_v31  ;;  %1851 = vst [vmem:[#allocation2 + $0x94] sm:$0xf] %v1835_v56  ;;  %v2184_v58 = vunpack.c.l.bf16 %v2040_v47  ;;  %v1990_v0 = vunpack.c.l.bf16 %v1446_v62  ;;  %v1626_v1 = vsub.f32 %v1594_v7, %v1610_v28  ;;  %v2928_v56 = vld [vmem:[#allocation2 + $0xac] sm:$0xf] }
 0x1a3   : > { %v1804_v11 = vunpack.c.l.bf16 %v1737_v18  ;;  %v2100_v57 = vpop.permute.xlu2 %2099  ;;  %v1785_v47 = vunpack.c.l.bf16 %v1641_v43  ;;  %v1399_v35 = vpack.c.bf16 %v1383_v17, %v1383_v17  ;;  %v1505_v5 = vperm.slane %v3752_v52, %v3435_v55 }
 0x1a4   : > { %v2237_v42 = vpack.c.bf16 %v2221_v39, %v2221_v39  ;;  %v2105_v13 = vperm.slane %v2100_v57, %v3435_v55  ;;  %v1368_v39 = vand.u32 15, %v1352_v30  ;;  %v1417_v57 = vand.u32 15, %v1337_v24 }
 0x1a5   : > { %v1820_v10 = vmul.f32 %v1804_v11, %v1788_v59  ;;  %v2850_v11 = vld [vmem:[#allocation2 + $0xb0] sm:$0xf0]  ;;  %v1591_v52 = vunpack.c.l.bf16 %v1399_v35 }
 0x1a6   : > { %2253 = vst [vmem:[#allocation2 + $0xbc] sm:$0xf] %v2237_v42  ;;  %v2200_v54 = vunpack.c.l.bf16 %v2105_v13  ;;  %v1642_v42 = vpack.c.bf16 %v1626_v1, %v1626_v1  ;;  %v1433_v6 = vcvt.s32.f32 %v1417_v57 }
 0x1a7   : > { %v1836_v16 = vpack.c.bf16 %v1820_v10, %v1820_v10 }
 0x1a8   : > { %v2216_v41 = vmul.f32 %v2200_v54, %v2184_v58  ;;  %v1412_v58 = vand.u32 15, %v1332_v61  ;;  %v1384_v54 = vcvt.s32.f32 %v1368_v39  ;;  %v1786_v62 = vunpack.c.l.bf16 %v1642_v42 }
 0x1a9   : > { %1852 = vst [vmem:[#allocation2 + $0xa4] sm:$0xf] %v1836_v16  ;;  %v1932_v51 = vpop.permute.xlu1 %1931  ;;  %v1892_v50 = vpop.permute.xlu0 %1891  ;;  %v1513_v61 = vperm.slane %v3776_v45, %v3435_v55  ;;  %v1449_v43 = vpack.c.bf16 %v1433_v6, %v1433_v6  ;;  %v1350_v39 = vshra.s32 %v1334_v40, 4 }
 0x1aa   : > { %v2232_v53 = vpack.c.bf16 %v2216_v41, %v2216_v41  ;;  %v1937_v38 = vperm.slane %v1932_v51, %v3435_v55  ;;  %v1897_v29 = vperm.slane %v1892_v50, %v3435_v55  ;;  %v1607_v41 = vunpack.c.l.bf16 %v1505_v5 }
 0x1ab   : > { %v1993_v45 = vunpack.c.l.bf16 %v1449_v43  ;;  %v2113_v5 = vperm.slane %v3934_v20, %v3435_v55 }
 0x1ac   : > { %2248 = vst [vmem:[#allocation2 + $0x6c] sm:$0xf] %v2232_v53  ;;  %v2011_v22 = vunpack.c.l.bf16 %v1937_v38  ;;  %v2006_v26 = vunpack.c.l.bf16 %v1897_v29  ;;  %v1708_v25 = vpop.permute.xlu2 %1707  ;;  %v1428_v53 = vcvt.s32.f32 %v1412_v58  ;;  %v1400_v38 = vpack.c.bf16 %v1384_v54, %v1384_v54 }
 0x1ad   : > { %v1713_v31 = vperm.slane %v1708_v25, %v3435_v55  ;;  %v2858_v60 = vld [vmem:[#allocation2 + $0xb8] sm:$0xf0]  ;;  %v1623_v17 = vsub.f32 %v1591_v52, %v1607_v41  ;;  %v2201_v52 = vunpack.c.l.bf16 %v2113_v5 }
 0x1ae   : > { %v2027_v46 = vsub.f32 %v1995_v12, %v2011_v22  ;;  %v2861_v18 = vor.u32 %v2928_v56, %v2858_v60  ;;  %v2022_v27 = vsub.f32 %v1990_v0, %v2006_v26  ;;  %v1444_v25 = vpack.c.bf16 %v1428_v53, %v1428_v53 }
 0x1af   : > { %v1801_v23 = vunpack.c.l.bf16 %v1713_v31  ;;  %v1592_v1 = vunpack.c.l.bf16 %v1400_v38  ;;  %v1608_v31 = vunpack.c.l.bf16 %v1513_v61 }
 0x1b0   : > { %v2043_v9 = vpack.c.bf16 %v2027_v46, %v2027_v46  ;;  %2561 = vmatpush.bf16.xpose.msra.mxu3 %v2861_v18  ;;  %v2927_v59 = vld [vmem:[#allocation2 + $0xa4] sm:$0xf]  ;;  %v2038_v16 = vpack.c.bf16 %v2022_v27, %v2022_v27  ;;  %v1639_v18 = vpack.c.bf16 %v1623_v17, %v1623_v17 }
 0x1b1   : > { %v1817_v13 = vmul.f32 %v1801_v23, %v1785_v47  ;;  %v2853_v63 = vor.u32 %v2927_v59, %v2850_v11  ;;  %v1988_v47 = vunpack.c.l.bf16 %v1444_v25  ;;  %v1624_v27 = vsub.f32 %v1592_v1, %v1608_v31  ;;  %v2924_v11 = vld [vmem:[#allocation2 + $0x8c] sm:$0xf] }
 0x1b2   : > { %v2187_v19 = vunpack.c.l.bf16 %v2043_v9  ;;  %v1716_v8 = vpop.permute.xlu1 %1715  ;;  %v3960_v10 = vpop.permute.xlu0 %2091  ;;  %v2182_v29 = vunpack.c.l.bf16 %v2038_v16 }
 0x1b3   : > { %v1833_v34 = vpack.c.bf16 %v1817_v13, %v1817_v13  ;;  %v1721_v37 = vperm.slane %v1716_v8, %v3435_v55  ;;  %2523 = vmatpush.bf16.xpose.msra.mxu1 %v2853_v63  ;;  %v1783_v63 = vunpack.c.l.bf16 %v1639_v18 }
 0x1b4   : > { %v2219_v24 = vmul.f32 %v2203_v44, %v2187_v19  ;;  %v1366_v44 = vand.u32 15, %v1350_v39 }
 0x1b5   : > { %1849 = vst [vmem:[#allocation2 + $0x74] sm:$0xf] %v1833_v34  ;;  %v1802_v7 = vunpack.c.l.bf16 %v1721_v37  ;;  %v2084_v28 = vpop.permute.xlu2 %2083  ;;  %v2834_v34 = vld [vmem:[#allocation2 + $0x90] sm:$0xf0]  ;;  %v1415_v37 = vand.u32 15, %v1335_v14 }
 0x1b6   : > { %v2235_v51 = vpack.c.bf16 %v2219_v24, %v2219_v24  ;;  %v2089_v50 = vperm.slane %v2084_v28, %v3435_v55  ;;  %v1640_v24 = vpack.c.bf16 %v1624_v27, %v1624_v27 }
 0x1b7   : > { %v1818_v12 = vmul.f32 %v1802_v7, %v1786_v62  ;;  %v1410_v62 = vand.u32 15, %v1330_v2  ;;  %v1382_v7 = vcvt.s32.f32 %v1366_v44  ;;  %v1431_v38 = vcvt.s32.f32 %v1415_v37 }
 0x1b8   : > { %2251 = vst [vmem:[#allocation2 + $0x9c] sm:$0xf] %v2235_v51  ;;  %v2198_v30 = vunpack.c.l.bf16 %v2089_v50  ;;  %v1784_v61 = vunpack.c.l.bf16 %v1640_v24  ;;  %v1497_v2 = vperm.slane %v3793_v49, %v3435_v55  ;;  %v1637_v49 = vpack.c.bf16 %v3741_v48, %v3741_v48 }
 0x1b9   : > { %v1834_v22 = vpack.c.bf16 %v1818_v12, %v1818_v12  ;;  %v1398_v43 = vpack.c.bf16 %v1382_v7, %v1382_v7  ;;  %v1447_v25 = vpack.c.bf16 %v1431_v38, %v1431_v38 }
 0x1ba   : > { %v2214_v0 = vmul.f32 %v2198_v30, %v2182_v29  ;;  %v1876_v26 = vpop.permute.xlu0 %1875  ;;  %v1426_v30 = vcvt.s32.f32 %v1410_v62  ;;  %v1781_v44 = vunpack.c.l.bf16 %v1637_v49 }
 0x1bb   : > { %1850 = vst [vmem:[#allocation2 + $0x84] sm:$0xf] %v1834_v22  ;;  %v1881_v56 = vperm.slane %v1876_v26, %v3435_v55  ;;  %v1916_v60 = vpop.permute.xlu1 %1915 }
 0x1bc   : > { %v2230_v32 = vpack.c.bf16 %v2214_v0, %v2214_v0  ;;  %v1921_v46 = vperm.slane %v1916_v60, %v3435_v55 }
 0x1bd   : > { %v2004_v23 = vunpack.c.l.bf16 %v1881_v56  ;;  %v1442_v56 = vpack.c.bf16 %v1426_v30, %v1426_v30 }
 0x1be   : > { %2246 = vst [vmem:[#allocation2 + $0x4c] sm:$0xf] %v2230_v32  ;;  %v2009_v35 = vunpack.c.l.bf16 %v1921_v46  ;;  %v1692_v9 = vpop.permute.xlu2 %1691  ;;  %v1590_v32 = vunpack.c.l.bf16 %v1398_v43  ;;  %v1606_v46 = vunpack.c.l.bf16 %v1497_v2 }
 0x1bf   : > { %v1697_v59 = vperm.slane %v1692_v9, %v3435_v55  ;;  %v2842_v57 = vld [vmem:[#allocation2 + $0x98] sm:$0xf0]  ;;  %v2020_v8 = vsub.f32 %v1988_v47, %v2004_v23  ;;  %v1991_v47 = vunpack.c.l.bf16 %v1447_v25  ;;  %v1986_v23 = vunpack.c.l.bf16 %v1442_v56  ;;  %v2902_v56 = vld [vmem:[%s4110_s0 + $0x14] sm:$0xf0] }
 0x1c0   : > { %v2025_v42 = vsub.f32 %v1993_v45, %v2009_v35  ;;  %v2845_v13 = vor.u32 %v2924_v11, %v2842_v57  ;;  %v2920_v57 = vld [vmem:[#allocation2 + $0x6c] sm:$0xf] }
 0x1c1   : > { %v1799_v19 = vunpack.c.l.bf16 %v1697_v59  ;;  %v2036_v50 = vpack.c.bf16 %v2020_v8, %v2020_v8  ;;  %v1622_v59 = vsub.f32 %v1590_v32, %v1606_v46 }
 0x1c2   : > { %v2041_v40 = vpack.c.bf16 %v2025_v42, %v2025_v42  ;;  %2562 = vmatpush.bf16.xpose.msra.mxu3 %v2845_v13  ;;  %v3975_v58 = vpop.permute.xlu0 %2075  ;;  %v2923_v54 = vld [vmem:[#allocation2 + $0x84] sm:$0xf]  ;;  %v2097_v42 = vperm.slane %v3960_v10, %v3435_v55 }
 0x1c3   : > { %v1815_v16 = vmul.f32 %v1799_v19, %v1783_v63  ;;  %v2837_v6 = vor.u32 %v2923_v54, %v2834_v34  ;;  %v2180_v22 = vunpack.c.l.bf16 %v2036_v50  ;;  %v2818_v54 = vld [vmem:[#allocation2 + $0x70] sm:$0xf0]  ;;  %v1638_v34 = vpack.c.bf16 %v1622_v59, %v1622_v59 }
 0x1c4   : > { %v2185_v20 = vunpack.c.l.bf16 %v2041_v40  ;;  %v1700_v41 = vpop.permute.xlu1 %1699  ;;  %v2081_v32 = vperm.slane %v3975_v58, %v3435_v55 }
 0x1c5   : > { %v1831_v28 = vpack.c.bf16 %v1815_v16, %v1815_v16  ;;  %v1705_v51 = vperm.slane %v1700_v41, %v3435_v55  ;;  %2524 = vmatpush.bf16.xpose.msra.mxu1 %v2837_v6  ;;  %v1413_v16 = vand.u32 15, %v1333_v36  ;;  %v2199_v6 = vunpack.c.l.bf16 %v2097_v42 }
 0x1c6   : > { %v2217_v53 = vmul.f32 %v2201_v52, %v2185_v20  ;;  %v2197_v58 = vunpack.c.l.bf16 %v2081_v32  ;;  %v2738_v32 = vld [vmem:[%s4110_s0 + $0x10] sm:$0xf0] }
 0x1c7   : > { %1847 = vst [vmem:[#allocation2 + $0x54] sm:$0xf] %v1831_v28  ;;  %v1800_v4 = vunpack.c.l.bf16 %v1705_v51  ;;  %v2068_v14 = vpop.permute.xlu2 %2067  ;;  %v1782_v28 = vunpack.c.l.bf16 %v1638_v34  ;;  %v2760_v34 = vld [vmem:[%s4110_s0 + $0x28] sm:$0xf] }
 0x1c8   : > { %v2233_v12 = vpack.c.bf16 %v2217_v53, %v2217_v53  ;;  %v2073_v29 = vperm.slane %v2068_v14, %v3435_v55  ;;  %v1429_v53 = vcvt.s32.f32 %v1413_v16 }
 0x1c9   : > { %v1816_v17 = vmul.f32 %v1800_v4, %v1784_v61 }
 0x1ca   : > { %2249 = vst [vmem:[#allocation2 + $0x7c] sm:$0xf] %v2233_v12  ;;  %v2196_v0 = vunpack.c.l.bf16 %v2073_v29  ;;  %v1860_v26 = vpop.permute.xlu0 %1859  ;;  %v1445_v29 = vpack.c.bf16 %v1429_v53, %v1429_v53  ;;  %v1635_v53 = vpack.c.bf16 %v3765_v15, %v3765_v15 }
 0x1cb   : > { %v1832_v1 = vpack.c.bf16 %v1816_v17, %v1816_v17  ;;  %v1865_v60 = vperm.slane %v1860_v26, %v3435_v55  ;;  %v2916_v26 = vld [vmem:[#allocation2 + $0x4c] sm:$0xf] }
 0x1cc   : > { %v2212_v31 = vmul.f32 %v2196_v0, %v2180_v22  ;;  %v1989_v22 = vunpack.c.l.bf16 %v1445_v29  ;;  %v1779_v29 = vunpack.c.l.bf16 %v1635_v53 }
 0x1cd   : > { %1848 = vst [vmem:[#allocation2 + $0x64] sm:$0xf] %v1832_v1  ;;  %v1900_v45 = vpop.permute.xlu1 %1899  ;;  %v2002_v35 = vunpack.c.l.bf16 %v1865_v60  ;;  %v2736_v60 = vld [vmem:[%s4110_s0] sm:$0xf] }
 0x1ce   : > { %v2228_v18 = vpack.c.bf16 %v2212_v31, %v2212_v31  ;;  %v1905_v39 = vperm.slane %v1900_v45, %v3435_v55  ;;  %v2744_v31 = vld [vmem:[%s4110_s0 + $0x8] sm:$0xf] }
 0x1cf   : > { %v2018_v8 = vsub.f32 %v1986_v23, %v2002_v35  ;;  %v2745_v45 = vor.u32 %v2902_v56, %v2744_v31 }
 0x1d0   : > { %2244 = vst [vmem:[#allocation2 + $0x2c] sm:$0xf] %v2228_v18  ;;  %v2007_v9 = vunpack.c.l.bf16 %v1905_v39  ;;  %v1676_v27 = vpop.permute.xlu2 %1675  ;;  %v2901_v18 = vld [vmem:[%s4110_s0 + $0xc] sm:$0xf0] }
 0x1d1   : > { %v1681_v11 = vperm.slane %v1676_v27, %v3435_v55  ;;  %v2826_v5 = vld [vmem:[#allocation2 + $0x78] sm:$0xf0]  ;;  %v2034_v62 = vpack.c.bf16 %v2018_v8, %v2018_v8  ;;  %v2737_v49 = vor.u32 %v2901_v18, %v2736_v60  ;;  %2548 = vmatmul.bf16.vlgmr.msra.gmra.mxu2 %v2745_v45  ;;  %v1636_v27 = vpack.c.bf16 %v3783_v33, %v3783_v33  ;;  %v2899_v60 = vld [vmem:[%s4110_s0 + $0x4] sm:$0xf]  ;;  %v2904_v45 = vld [vmem:[%s4110_s0 + $0x2c] sm:$0xf] }
 0x1d2   : > { %v2023_v13 = vsub.f32 %v1991_v47, %v2007_v9  ;;  %v2829_v63 = vor.u32 %v2920_v57, %v2826_v5  ;;  %v2802_v47 = vld [vmem:[#allocation2 + $0x50] sm:$0xf0]  ;;  %v1411_v9 = vand.u32 15, %v1331_v21  ;;  %v2762_v18 = vld [vmem:[%s4110_s0 + $0x38] sm:$0xf0] }
 0x1d3   : > { %v1797_v19 = vunpack.c.l.bf16 %v1681_v11  ;;  %v2178_v14 = vunpack.c.l.bf16 %v2034_v62  ;;  %2510 = vmatmul.bf16.vlgmr.msra.gmra.mxu0 %v2737_v49  ;;  %v2754_v49 = vld [vmem:[%s4110_s0 + $0x30] sm:$0xf0] }
 0x1d4   : > { %v2039_v40 = vpack.c.bf16 %v2023_v13, %v2023_v13  ;;  %2563 = vmatpush.bf16.xpose.msra.mxu3 %v2829_v63  ;;  %v2919_v48 = vld [vmem:[#allocation2 + $0x64] sm:$0xf]  ;;  %v1427_v42 = vcvt.s32.f32 %v1411_v9  ;;  %v1780_v13 = vunpack.c.l.bf16 %v1636_v27  ;;  %v3043_v9 = vld [vmem:[%s324_s8] ss:$0 sm:$0xff] }
 0x1d5   : > { %v1813_v37 = vmul.f32 %v1797_v19, %v1781_v44  ;;  %v2821_v24 = vor.u32 %v2919_v48, %v2818_v54  ;;  %v2060_v48 = vpop.permute.xlu0 %2059 }
 0x1d6   : > { %v2183_v52 = vunpack.c.l.bf16 %v2039_v40  ;;  %v1684_v20 = vpop.permute.xlu1 %1683  ;;  %v1443_v3 = vpack.c.bf16 %v1427_v42, %v1427_v42 }
 0x1d7   : > { %v1829_v41 = vpack.c.bf16 %v1813_v37, %v1813_v37  ;;  %v1689_v10 = vperm.slane %v1684_v20, %v3435_v55  ;;  %2525 = vmatpush.bf16.xpose.msra.mxu1 %v2821_v24  ;;  %v2906_v37 = vld [vmem:[%s4110_s0 + $0x34] sm:$0xf0]  ;;  %v2752_v24 = vld [vmem:[%s4110_s0 + $0x20] sm:$0xf]  ;;  %v2912_v16 = vld [vmem:[#allocation2 + $0x2c] sm:$0xf] }
 0x1d8   : > { %v2215_v7 = vmul.f32 %v2199_v6, %v2183_v52  ;;  %v1987_v40 = vunpack.c.l.bf16 %v1443_v3  ;;  %v2761_v52 = vor.u32 %v2906_v37, %v2760_v34  ;;  %v2905_v20 = vld [vmem:[%s4110_s0 + $0x2c] sm:$0xf0] }
 0x1d9   : > { %1845 = vst [vmem:[#allocation2 + $0x34] sm:$0xf] %v1829_v41  ;;  %v1798_v51 = vunpack.c.l.bf16 %v1689_v10  ;;  %v2052_v50 = vpop.permute.xlu2 %2051  ;;  %v2065_v41 = vperm.slane %v2060_v48, %v3435_v55 }
 0x1da   : > { %v2231_v38 = vpack.c.bf16 %v2215_v7, %v2215_v7  ;;  %v2057_v61 = vperm.slane %v2052_v50, %v3435_v55  ;;  %v2753_v7 = vor.u32 %v2905_v20, %v2752_v24 }
 0x1db   : > { %v1814_v4 = vmul.f32 %v1798_v51, %v1782_v28 }
 0x1dc   : > { %2247 = vst [vmem:[#allocation2 + $0x5c] sm:$0xf] %v2231_v38  ;;  %v2194_v36 = vunpack.c.l.bf16 %v2057_v61  ;;  %v2195_v61 = vunpack.c.l.bf16 %v2065_v41 }
 0x1dd   : > { %v1830_v12 = vpack.c.bf16 %v1814_v4, %v1814_v4 }
 0x1de   : > { %v2210_v30 = vmul.f32 %v2194_v36, %v2178_v14 }
 0x1df   : > { %1846 = vst [vmem:[#allocation2 + $0x44] sm:$0xf] %v1830_v12 }
 0x1e0   : > { %v2226_v43 = vpack.c.bf16 %v2210_v30, %v2210_v30  ;;  %v1884_v2 = vpop.permute.xlu1 %1883  ;;  %v2786_v50 = vld [vmem:[#allocation2 + $0x30] sm:$0xf0] }
 0x1e1   : > { %v1889_v17 = vperm.slane %v1884_v2, %v3435_v55  ;;  %2553 = vmatmul.bf16.gmra.mxu2 %v2761_v52 }
 0x1e2   : > { %2242 = vst [vmem:[#allocation2 + $0xc] sm:$0xf] %v2226_v43 }
 0x1e3   : > { %v2005_v0 = vunpack.c.l.bf16 %v1889_v17  ;;  %v2810_v25 = vld [vmem:[#allocation2 + $0x58] sm:$0xf0]  ;;  %2515 = vmatmul.bf16.gmra.mxu0 %v2753_v7 }
 0x1e4   : > { %v2813_v1 = vor.u32 %v2916_v26, %v2810_v25  ;;  %v2907_v25 = vld [vmem:[#allocation2 + $0x4] sm:$0xf] }
 0x1e5   : > { %v2021_v46 = vsub.f32 %v1989_v22, %v2005_v0 }
 0x1e6   : > { %2564 = vmatpush.bf16.xpose.msra.mxu3 %v2813_v1  ;;  %v2915_v39 = vld [vmem:[#allocation2 + $0x44] sm:$0xf]  ;;  %v2900_v1 = vld [vmem:[%s4110_s0 + $0xc] sm:$0xf] }
 0x1e7   : > { %v2037_v23 = vpack.c.bf16 %v2021_v46, %v2021_v46  ;;  %v2805_v35 = vor.u32 %v2915_v39, %v2802_v47  ;;  %v2741_v46 = vor.u32 %v2899_v60, %v2738_v32  ;;  %v2765_v39 = vor.u32 %v2904_v45, %v2762_v18  ;;  %v2903_v47 = vld [vmem:[%s4110_s0 + $0x24] sm:$0xf] }
 0x1e9   : > { %v2181_v59 = vunpack.c.l.bf16 %v2037_v23  ;;  %v1668_v11 = vpop.permute.xlu1 %1667  ;;  %2526 = vmatpush.bf16.xpose.msra.mxu1 %v2805_v35  ;;  %v2908_v22 = vld [vmem:[#allocation2 + $0xc] sm:$0xf]  ;;  %v2757_v23 = vor.u32 %v2903_v47, %v2754_v49 }
 0x1ea   : > { %v1673_v57 = vperm.slane %v1668_v11, %v3435_v55 }
 0x1eb   : > { %v2213_v5 = vmul.f32 %v2197_v58, %v2181_v59 }
 0x1ec   : > { %v1796_v63 = vunpack.c.l.bf16 %v1673_v57 }
 0x1ed   : > { %v2229_v44 = vpack.c.bf16 %v2213_v5, %v2213_v5 }
 0x1ee   : > { %v1812_v19 = vmul.f32 %v1796_v63, %v1780_v13 }
 0x1ef   : > { %2245 = vst [vmem:[#allocation2 + $0x3c] sm:$0xf] %v2229_v44 }
 0x1f0   : > { %v1828_v21 = vpack.c.bf16 %v1812_v19, %v1812_v19 }
 0x1f2   : > { %1844 = vst [vmem:[#allocation2 + $0x24] sm:$0xf] %v1828_v21  ;;  %v1868_v8 = vpop.permute.xlu1 %1867 }
 0x1f3   : > { %v1873_v33 = vperm.slane %v1868_v8, %v3435_v55 }
 0x1f5   : > { %v2003_v54 = vunpack.c.l.bf16 %v1873_v33 }
 0x1f6   : > { %v2794_v6 = vld [vmem:[#allocation2 + $0x38] sm:$0xf0] }
 0x1f7   : > { %v2019_v10 = vsub.f32 %v1987_v40, %v2003_v54  ;;  %v2797_v62 = vor.u32 %v2912_v16, %v2794_v6 }
 0x1f9   : > { %v2035_v28 = vpack.c.bf16 %v2019_v10, %v2019_v10  ;;  %2565 = vmatpush.bf16.xpose.msra.mxu3 %v2797_v62  ;;  %v2911_v51 = vld [vmem:[#allocation2 + $0x24] sm:$0xf] }
 0x1fa   : > { %v2789_v38 = vor.u32 %v2911_v51, %v2786_v50 }
 0x1fb   : > { %v2179_v4 = vunpack.c.l.bf16 %v2035_v28  ;;  %v1660_v14 = vpop.permute.xlu1 %1659 }
 0x1fc   : > { %v1665_v36 = vperm.slane %v1660_v14, %v3435_v55  ;;  %2527 = vmatpush.bf16.xpose.msra.mxu1 %v2789_v38  ;;  %v2746_v55 = vld [vmem:[%s4110_s0 + $0x18] sm:$0xf0] }
 0x1fd   : > { %v2211_v12 = vmul.f32 %v2195_v61, %v2179_v4  ;;  %v2749_v56 = vor.u32 %v2900_v1, %v2746_v55 }
 0x1fe   : > { %v1795_v30 = vunpack.c.l.bf16 %v1665_v36 }
 0x1ff   : > { %v2227_v43 = vpack.c.bf16 %v2211_v12, %v2211_v12 }
 0x200   : > { %v1811_v2 = vmul.f32 %v1795_v30, %v1779_v29 }
 0x201   : > { %2243 = vst [vmem:[#allocation2 + $0x1c] sm:$0xf] %v2227_v43 }
 0x202   : > { %v1827_v17 = vpack.c.bf16 %v1811_v2, %v1811_v2 }
 0x204   : > { %1843 = vst [vmem:[#allocation2 + $0x14] sm:$0xf] %v1827_v17 }
 0x208   : > { %v2778_v0 = vld [vmem:[#allocation2 + $0x18] sm:$0xf0] }
 0x209   : > { %v2781_v26 = vor.u32 %v2908_v22, %v2778_v0 }
 0x20b   : > { %2566 = vmatpush.bf16.xpose.msra.mxu3 %v2781_v26  ;;  %v2770_v15 = vld [vmem:[#allocation2 + $0x10] sm:$0xf0] }
 0x20c   : > { %v2773_v31 = vor.u32 %v2907_v25, %v2770_v15 }
 0x20e   : > { %2528 = vmatpush.bf16.xpose.msra.mxu1 %v2773_v31 }
 0x212   : > { %2567 = vmatmul.bf16.vlgmr.msra.gmra.mxu3 %v2749_v56 }
 0x215   : > { %2529 = vmatmul.bf16.vlgmr.msra.gmra.mxu1 %v2741_v46 }
 0x222   : > { %2572 = vmatmul.bf16.gmra.mxu3 %v2765_v39 }
 0x225   : > { %2534 = vmatmul.bf16.gmra.mxu1 %v2757_v23 }
 0x250   : > { %v2511_v35 = vpop.f32.mrf.mxu0 }
 0x251   : > { %v2512_v58 = vadd.f32 %v3043_v9, %v2511_v35 }
 0x254   : > { %v2549_v27 = vpop.f32.mrf.mxu2 }
 0x258   : > { %v2513_v59 = vpop.f32.mrf.mxu0 }
 0x259   : > { %v2514_v44 = vadd.f32 %v3043_v9, %v2513_v59 }
 0x25c   : > { %v2551_v63 = vpop.f32.mrf.mxu2 }
 0x260   : > { %v2516_v21 = vpop.f32.mrf.mxu0 }
 0x261   : > { %v2517_v40 = vadd.f32 %v3043_v9, %v2516_v21 }
 0x264   : > { %v2554_v54 = vpop.f32.mrf.mxu2 }
 0x268   : > { %v2518_v6 = vpop.f32.mrf.mxu0 }
 0x269   : > { %v2519_v20 = vadd.f32 %v3043_v9, %v2518_v6 }
 0x26c   : > { %v2556_v62 = vpop.f32.mrf.mxu2 }
 0x292   : > { %v2530_v11 = vpop.f32.mrf.mxu1 }
 0x293   : > { %v2531_v57 = vadd.f32 %v2530_v11, %v2512_v58 }
 0x295   : > { %v2550_v5 = vadd.f32 %v2549_v27, %v2531_v57  ;;  %v2568_v42 = vpop.f32.mrf.mxu3 }
 0x297   : > { %v2569_v13 = vadd.f32 %v2568_v42, %v2550_v5 }
 0x299   : > { %2578 = vst [vmem:[%s4065_s25] sm:$0xff] %v2569_v13 }
 0x29a   : > { %v2532_v19 = vpop.f32.mrf.mxu1 }
 0x29b   : > { %v2533_v3 = vadd.f32 %v2532_v19, %v2514_v44 }
 0x29d   : > { %v2552_v8 = vadd.f32 %v2551_v63, %v2533_v3  ;;  %v2570_v33 = vpop.f32.mrf.mxu3 }
 0x29f   : > { %v2571_v48 = vadd.f32 %v2570_v33, %v2552_v8 }
 0x2a1   : > { %2579 = vst [vmem:[%s4065_s25 + $0x8] sm:$0xff] %v2571_v48 }
 0x2a2   : > { %v2535_v34 = vpop.f32.mrf.mxu1 }
 0x2a3   : > { %v2536_v37 = vadd.f32 %v2535_v34, %v2517_v40 }
 0x2a5   : > { %v2555_v24 = vadd.f32 %v2554_v54, %v2536_v37  ;;  %v2573_v16 = vpop.f32.mrf.mxu3 }
 0x2a7   : > { %v2574_v52 = vadd.f32 %v2573_v16, %v2555_v24 }
 0x2a9   : > { %2580 = vst [vmem:[%s4065_s25 + $0x10] sm:$0xff] %v2574_v52 }
 0x2aa   : > { %v2537_v41 = vpop.f32.mrf.mxu1 }
 0x2ab   : > { %v2538_v10 = vadd.f32 %v2537_v41, %v2519_v20 }
 0x2ad   : > { %v2557_v7 = vadd.f32 %v2556_v62, %v2538_v10  ;;  %v2575_v28 = vpop.f32.mrf.mxu3 }
 0x2af   : > { %v2576_v51 = vadd.f32 %v2575_v28, %v2557_v7 }
 0x2b1   : > { %2581 = vst [vmem:[%s4065_s25 + $0x18] sm:$0xff] %v2576_v51 }
 0x2b2   : > { %3098 = shalt.err (!%p3095_p7)
}
 0x2b3   : > { %s3156_s17 = smov 128   ;;  %s3157_s25 = smov 384  }
 0x2b4   : > { %s3158_s27 = smov 8  }
 0x2b5   : > { %2939 = dma.vmem_to_hbm [thread:$0]  (%p3229_p4), %s2598_s9, 512, %s2600_s10, %s2583_s21, %s3156_s17, %s3157_s25, %s3158_s27  }
 0x2b6 PF: > { %p2945_p9 = scmp.ge.s32.totalorder %s3149_s23, 2  ;;  %s2614_s8 = sand.u32 1, %s3129_s18  }
 0x2b7   : > { %s2615_s29 = scalar_lea.sflag [#allocation4], %s2614_s8 }
 0x2b8   : > { %p2942_p10 = pnand %p2945_p9, %p3236_p8 }
 0x2ba   : > { %p2943_p11 = pneg %p2942_p10 }
 0x2bc   : > { %3124 = dma.done.wait (%p2943_p11), %s2615_s29, 512  }
 0x2bd   : > { %3126 = vsyncadd (%p2943_p11), %s2615_s29, 4294966784  ;;  %s18_s23 = sadd.s32 1, %s3149_s23   ;;  %s4154_s18 = smov %s3133_s19 }
 0x2be   : > { %p15_p12 = scmp.ge.s32.totalorder %s18_s23, 5   ;;  %s4155_s19 = smov %s3137_s20 }
 0x2bf   : > { %s4156_s20 = smov %s3242_s6  ;;  %s4157_s21 = smov %s3145_s22 }
 0x2c0   : > { %s4158_s22 = smov %s4160_s26  ;;  %17 = sbr.rel (!%p15_p12) target bundleno = 4 (0x4), region = 91 }
 0x2c5   :  { %2621 = vsyncpa [#allocation4], 1 }
 0x2c6   :  { %2623 = vsyncpa [#allocation4 + $0x1], 1 }

</bundles_post_ra>
